<compile_context>
chip_gen: v6e
topology: v6e:2x2x1
jax: 0.10.0
libtpu: 0.0.40
codegen_flags: <defaults>
</compile_context>

<pallas_src>
import jax
import jax.numpy as jnp
from jax.experimental import pallas as pl
from jax.experimental.pallas import tpu as pltpu


# --------------------------------------------------------------------------- #
# Kernel                                                                      #
# --------------------------------------------------------------------------- #
def _upsample_conv_kernel(xm_ref, xh_ref, w_ref, b_ref, o_ref, xcat_ref):
    # xm_ref  : (TH,   W+2, Cin)      main rows of the zero-padded ORIGINAL input
    # xh_ref  : (2,    W+2, Cin)      2-row halo directly below the main rows
    # w_ref   : (2, 2, 3*Cin, 2*TC)   K-concatenated polyphase weights [a, dh]
    # b_ref   : (1, 2*TC)             f32 bias duplicated over the 2 column phases
    # o_ref   : (TH, 2, W, 2*TC)      reshapes (for free) to (2*TH, 2*W, TC)
    # xcat_ref: (TH+2, W, 3*Cin)      column-compacted LHS scratch (compute dtype)
    TH = xm_ref.shape[0]
    W = xm_ref.shape[1] - 2
    Cin = xm_ref.shape[2]
    K = 3 * Cin
    Cout2 = o_ref.shape[-1]

    # Column compaction: xcat[r, j, s*Cin + c] = xwin[r, j + s, c].
    # Three copies per step (one per column tap) replace the 12 per-tap
    # sublane-offset slice relayouts of the previous version; it is built
    # directly from the input blocks (no separate window-assembly round trip).
    for s in range(3):
        xcat_ref[0:TH, :, s * Cin:(s + 1) * Cin] = xm_ref[:, s:s + W, :]
        xcat_ref[TH:TH + 2, :, s * Cin:(s + 1) * Cin] = xh_ref[:, s:s + W, :]

    # Four K = 3*Cin matmuls (2 row phases x 2 row taps).  The LHS slices start
    # at whole-row offsets along the leading (non-tiled) axis, so they are free
    # views; accumulation stays in jnp f32 values (Mosaic can keep it in the
    # MXU result path) and each phase is stored to the output exactly once.
    for a in range(2):
        acc = jnp.dot(xcat_ref[a:a + TH].reshape(TH * W, K), w_ref[a, 0],
                      preferred_element_type=jnp.float32)
        acc = acc + jnp.dot(xcat_ref[a + 1:a + 1 + TH].reshape(TH * W, K),
                            w_ref[a, 1], preferred_element_type=jnp.float32)
        acc = acc + b_ref[...]
        o_ref[:, a, :, :] = acc.reshape(TH, W, Cout2).astype(o_ref.dtype)


# --------------------------------------------------------------------------- #
# Host-side helpers                                                           #
# --------------------------------------------------------------------------- #
def _polyphase_weights(w_oihw):
    """torch (Cout, Cin, 3, 3) -> (2, 2, 3*Cin, 2*Cout) K-concatenated taps.

    out[a, dh, s*Cin + ci, b*Cout + co] multiplies xpad[i+a+dh, j+s, ci] in the
    expression for y[2i+a, 2j+b, co], where xpad is the zero-padded ORIGINAL
    input and y = conv3x3(nearest_upsample_2x(x)).  Folding happens in the
    weight's own (f32) dtype; casting to the compute dtype is done afterwards.
    """
    cout, cin = w_oihw.shape[0], w_oihw.shape[1]
    W = jnp.transpose(w_oihw, (2, 3, 1, 0))              # (kh, kw, ci, co)
    # Row taps per (row phase a, row offset dh).
    R = jnp.stack([
        jnp.stack([W[0],        W[1] + W[2]], axis=0),   # a = 0
        jnp.stack([W[0] + W[1], W[2]],        axis=0),   # a = 1
    ], axis=0)                                           # (a, dh, kw, ci, co)
    # Column taps per (col phase b, col offset dw).
    Q0 = jnp.stack([R[:, :, 0], R[:, :, 1] + R[:, :, 2]], axis=2)  # b = 0
    Q1 = jnp.stack([R[:, :, 0] + R[:, :, 1], R[:, :, 2]], axis=2)  # b = 1
    Z = jnp.zeros((2, 2, cin, cout), W.dtype)
    # tap column index s = b + dw ; expanded output channel = b*Cout + co
    s0 = jnp.concatenate([Q0[:, :, 0], Z],           axis=-1)      # only b=0 sees s=0
    s1 = jnp.concatenate([Q0[:, :, 1], Q1[:, :, 0]], axis=-1)      # both phases see s=1
    s2 = jnp.concatenate([Z,           Q1[:, :, 1]], axis=-1)      # only b=1 sees s=2
    taps = jnp.stack([s0, s1, s2], axis=2)               # (a, dh, s, ci, 2*co)
    return taps.reshape(2, 2, 3 * cin, 2 * cout)


def _vmem_capacity_bytes():
    """Per-core VMEM capacity (128 MiB on v5e/v6e, 64 MiB on v7x)."""
    try:
        info = pltpu.get_tpu_info()
        cap = getattr(info, "vmem_capacity_bytes", None)
        if cap:
            return int(cap)
    except Exception:
        pass
    return 64 * 2**20          # conservative fallback (v7x per-TensorCore)


def _working_set_bytes(th, tc, w, cin, cout, in_bpe, out_bpe):
    """Estimated VMEM working set for one grid step (double-buffered blocks)."""
    main = th * (w + 2) * cin * in_bpe
    halo = 2 * (w + 2) * cin * in_bpe
    wts = 2 * 2 * 3 * cin * (2 * tc) * in_bpe
    bia = 2 * tc * 4
    outb = th * 2 * w * (2 * tc) * out_bpe
    xcat = (th + 2) * w * 3 * cin * in_bpe
    f32_tmp = 2 * th * w * (2 * tc) * 4        # live f32 matmul temporaries
    return 2 * (main + halo + wts + bia + outb) + xcat + f32_tmp


def _choose_tiles(n, h, w, cin, cout, in_bpe, out_bpe, budget):
    """Pick (row tile TH, cout tile TC) against a per-generation VMEM budget."""
    # ---- Cout tile: keep the 2*TC lane axis a multiple of 256 (full MXU
    # output width on v6e/v7x) or leave Cout untiled (no input re-reads). ----
    def w_bytes(tc):
        return 2 * (2 * 2 * 3 * cin * 2 * tc * in_bpe)   # double-buffered

    if cout <= 256 or w_bytes(cout) <= budget // 3:
        tc = cout
    else:
        tc = None
        for cand in (256, 128):
            if cout % cand == 0 and w_bytes(cand) <= budget // 3:
                tc = cand
                break
        if tc is None:
            tc = next((c for c in (256, 128) if cout % c == 0), cout)
    n_ct = cout // tc

    # ---- Row tile: largest even divisor of h that fits the budget, subject
    # only to a small minimum number of total grid steps (pipeline + both v7x
    # TensorCores stay busy; the pipeline runs over the whole flattened grid).
    divs = sorted((d for d in range(2, h + 1, 2) if h % d == 0), reverse=True)
    if not divs:
        raise NotImplementedError(f"unsupported (odd) spatial height {h}")

    def fits(th):
        return _working_set_bytes(th, tc, w, cin, cout, in_bpe, out_bpe) <= budget

    min_steps = 4
    th = next((d for d in divs if fits(d) and n * n_ct * (h // d) >= min_steps),
              None)
    if th is None:
        th = next((d for d in divs if fits(d)), divs[-1])
    return th, tc


# --------------------------------------------------------------------------- #
# Forward                                                                     #
# --------------------------------------------------------------------------- #
def upsample_forward(x_nchw, w_oihw=None, bias=None, *, use_conv=True,
                     compute_dtype=jnp.bfloat16):
    """Forward pass of Upsample(channels, use_conv, dims=2, padding=1).

    compute_dtype: MXU input dtype for activations/weights (default bfloat16,
    the native MXU path on v5e/v6e/v7x); accumulation and bias stay float32.
    """
    if not use_conv:
        # Pure nearest-neighbour 2x upsample, directly in NCHW (no transposes).
        return jnp.repeat(jnp.repeat(x_nchw, 2, axis=2), 2, axis=3)

    N, C, h, w = x_nchw.shape
    if h % 2 != 0:
        # TODO(synk): odd spatial heights need a different halo scheme.
        raise NotImplementedError("upsample_forward requires an even input height")

    out_dtype = x_nchw.dtype
    cdt = jnp.dtype(compute_dtype)
    cout = w_oihw.shape[0]

    # NCHW -> NHWC glue + zero-pad at ORIGINAL resolution + cast to compute dtype.
    x = jnp.transpose(x_nchw, (0, 2, 3, 1))
    xp = jnp.pad(x, ((0, 0), (1, 1), (1, 1), (0, 0))).astype(cdt)   # (N, h+2, w+2, C)

    # Polyphase taps folded in f32, cast once; bias stays f32.
    w_cat = _polyphase_weights(w_oihw).astype(cdt)                  # (2, 2, 3C, 2*cout)
    b2 = jnp.tile(bias.astype(jnp.float32), 2).reshape(1, 2 * cout)

    cap = _vmem_capacity_bytes()
    budget = int(cap * 0.70)
    TH, TC = _choose_tiles(N, h, w, C, cout, cdt.itemsize,
                           jnp.dtype(out_dtype).itemsize, budget)
    n_rt = h // TH
    n_ct = cout // TC
    ws = _working_set_bytes(TH, TC, w, C, cout, cdt.itemsize,
                            jnp.dtype(out_dtype).itemsize)
    vmem_limit = min(cap, max(int(cap * 0.85), ws + (8 << 20)))

    out5 = pl.pallas_call(
        _upsample_conv_kernel,
        out_shape=jax.ShapeDtypeStruct((N, h, 2, w, 2 * cout), out_dtype),
        grid_spec=pltpu.PrefetchScalarGridSpec(
            num_scalar_prefetch=0,
            grid=(N, n_ct, n_rt),
            in_specs=[
                # main rows of the padded original input
                pl.BlockSpec((None, TH, w + 2, C),
                             lambda n, ct, t: (n, t, 0, 0)),
                # 2-row halo directly below the main rows (same array)
                pl.BlockSpec((None, 2, w + 2, C),
                             lambda n, ct, t: (n, t * (TH // 2) + TH // 2, 0, 0)),
                # K-concatenated polyphase weights (constant along the inner row
                # axis -> only re-fetched when the cout tile changes)
                pl.BlockSpec((2, 2, 3 * C, 2 * TC),
                             lambda n, ct, t: (0, 0, 0, ct)),
                pl.BlockSpec((1, 2 * TC),
                             lambda n, ct, t: (0, ct)),
            ],
            out_specs=pl.BlockSpec((None, TH, 2, w, 2 * TC),
                                   lambda n, ct, t: (n, t, 0, 0, ct)),
            scratch_shapes=[
                pltpu.VMEM((TH + 2, w, 3 * C), cdt),     # compacted LHS scratch
            ],
        ),
        compiler_params=pltpu.CompilerParams(
            dimension_semantics=("parallel", "parallel", "parallel"),
            vmem_limit_bytes=vmem_limit,
        ),
    )(xp, xp, w_cat, b2)

    # (N, h, 2, w, 2*Cout) -> (N, 2h, 2w, Cout): pure dim merges (free in XLA).
    out_nhwc = out5.reshape(N, 2 * h, 2 * w, cout)
    return jnp.transpose(out_nhwc, (0, 3, 1, 2))          # back to NCHW (glue)


# --------------------------------------------------------------------------- #
# Module wrapper                                                              #
# --------------------------------------------------------------------------- #
class Upsample:
    """JAX/Pallas port of the PyTorch Upsample module (dims=2 path)."""

    def __init__(self, channels, use_conv, out_channels=None, key=None,
                 compute_dtype=jnp.bfloat16):
        self.channels = channels
        self.out_channels = out_channels or channels
        self.use_conv = use_conv
        self.compute_dtype = compute_dtype
        if use_conv:
            key = key if key is not None else jax.random.PRNGKey(42)
            kw, kb = jax.random.split(key)
            # deterministic synthetic params, torch conv layout (Cout, Cin, 3, 3)
            self.weight = 0.1 * jax.random.normal(
                kw, (self.out_channels, channels, 3, 3), jnp.float32)
            self.bias = 0.1 * jax.random.normal(
                kb, (self.out_channels,), jnp.float32)
        else:
            self.weight, self.bias = None, None

    def __call__(self, x_nchw):
        assert x_nchw.shape[1] == self.channels
        return upsample_forward(x_nchw, self.weight, self.bias,
                                use_conv=self.use_conv,
                                compute_dtype=self.compute_dtype)


# --------------------------------------------------------------------------- #
# Reference + test                                                            #
# --------------------------------------------------------------------------- #
def _reference(x_nchw, w_oihw, bias, cast_dtype=None):
    if cast_dtype is not None:   # emulate the kernel's input/weight quantization
        x_nchw = x_nchw.astype(cast_dtype).astype(jnp.float32)
        w_oihw = w_oihw.astype(cast_dtype).astype(jnp.float32)
    x_up = jnp.repeat(jnp.repeat(x_nchw, 2, axis=2), 2, axis=3)
    out = jax.lax.conv_general_dilated(
        x_up, w_oihw, window_strides=(1, 1), padding=((1, 1), (1, 1)),
        dimension_numbers=("NCHW", "OIHW", "NCHW"))
    return out + bias[None, :, None, None]


if __name__ == "__main__":
    key = jax.random.PRNGKey(0)
    kx, kp, kx2, kp2 = jax.random.split(key, 4)

    # Case 1: default bf16 compute, Cin == Cout, multiple row tiles
    # (exercises the halo BlockSpec for t > 0).
    N, C, h, w = 2, 4, 16, 16
    x = jax.random.normal(kx, (N, C, h, w), jnp.float32)
    mod = Upsample(channels=C, use_conv=True, key=kp)
    out = jax.block_until_ready(mod(x))
    assert out.shape == (N, C, 2 * h, 2 * w), out.shape
    ref = _reference(x, mod.weight, mod.bias, cast_dtype=jnp.bfloat16)
    if not jnp.allclose(out, ref, atol=1e-2, rtol=1e-2):
        raise AssertionError("Pallas Upsample (bf16, case 1) does not match reference")

    # Case 2: f32 compute path, Cout != Cin, smaller spatial size (tight check
    # of the polyphase math and the halo/tiling index maps).
    N2, C2, h2, w2 = 1, 4, 8, 16
    x2 = jax.random.normal(kx2, (N2, C2, h2, w2), jnp.float32)
    mod2 = Upsample(channels=C2, use_conv=True, out_channels=8, key=kp2,
                    compute_dtype=jnp.float32)
    out2 = jax.block_until_ready(mod2(x2))
    assert out2.shape == (N2, 8, 2 * h2, 2 * w2), out2.shape
    ref2 = _reference(x2, mod2.weight, mod2.bias)
    if not jnp.allclose(out2, ref2, atol=2e-4, rtol=2e-4):
        raise AssertionError("Pallas Upsample (f32, case 2) does not match reference")

    # Case 3: use_conv=False path (pure nearest upsample, stays in NCHW).
    mod3 = Upsample(channels=C, use_conv=False)
    out3 = jax.block_until_ready(mod3(x))
    assert out3.shape == (N, C, 2 * h, 2 * w)
    ref3 = jnp.repeat(jnp.repeat(x, 2, axis=2), 2, axis=3)
    assert jnp.array_equal(out3, ref3)

    print("KERNEL_OK")
</pallas_src>

<mosaic_0001>
module attributes {stable_mosaic.version = 11 : i64} {
  func.func @_upsample_conv_kernel(%arg0: i32, %arg1: i32, %arg2: i32, %arg3: memref<1x8x18x4xbf16, #tpu.memory_space<vmem>>, %arg4: memref<1x2x18x4xbf16, #tpu.memory_space<vmem>>, %arg5: memref<2x2x12x8xbf16, #tpu.memory_space<vmem>>, %arg6: memref<1x8xf32, #tpu.memory_space<vmem>>, %arg7: memref<1x8x2x16x8xf32, #tpu.memory_space<vmem>>, %arg8: memref<10x16x12xbf16, #tpu.memory_space<vmem>>) attributes {dimension_semantics = [#tpu.dimension_semantics<parallel>, #tpu.dimension_semantics<parallel>, #tpu.dimension_semantics<parallel>], iteration_bounds = array<i64: 2, 1, 2>, scalar_prefetch = 0 : i64, scratch_operands = 1 : i64, tpu.core_type = #tpu.core_type<tc>, window_params = [{transform_indices = @transform_0, window_bounds = array<i64: 1, 8, 18, 4>}, {transform_indices = @transform_1, window_bounds = array<i64: 1, 2, 18, 4>}, {transform_indices = @transform_2, window_bounds = array<i64: 2, 2, 12, 8>}, {transform_indices = @transform_3, window_bounds = array<i64: 1, 8>}, {transform_indices = @transform_4, window_bounds = array<i64: 1, 8, 2, 16, 8>}]} {
    %c0 = arith.constant 0 : index
    %c0_0 = arith.constant 0 : index
    %c0_1 = arith.constant 0 : index
    %c0_2 = arith.constant 0 : index
    %0 = vector.load %arg3[%c0, %c0_0, %c0_1, %c0_2] : memref<1x8x18x4xbf16, #tpu.memory_space<vmem>>, vector<1x8x16x4xbf16>
    %1 = vector.shape_cast %0 : vector<1x8x16x4xbf16> to vector<8x16x4xbf16>
    %c0_3 = arith.constant 0 : index
    %c0_4 = arith.constant 0 : index
    %c0_5 = arith.constant 0 : index
    %2 = vector.load %arg8[%c0_3, %c0_4, %c0_5] : memref<10x16x12xbf16, #tpu.memory_space<vmem>>, vector<8x16x4xbf16>
    tpu.vector_store %arg8[%c0_3, %c0_4, %c0_5], %1 {strides = array<i32>} : memref<10x16x12xbf16, #tpu.memory_space<vmem>>, vector<8x16x4xbf16>,
    %c0_6 = arith.constant 0 : index
    %c0_7 = arith.constant 0 : index
    %c0_8 = arith.constant 0 : index
    %c0_9 = arith.constant 0 : index
    %3 = vector.load %arg4[%c0_6, %c0_7, %c0_8, %c0_9] : memref<1x2x18x4xbf16, #tpu.memory_space<vmem>>, vector<1x2x16x4xbf16>
    %4 = vector.shape_cast %3 : vector<1x2x16x4xbf16> to vector<2x16x4xbf16>
    %c8 = arith.constant 8 : index
    %c0_10 = arith.constant 0 : index
    %c0_11 = arith.constant 0 : index
    %5 = vector.load %arg8[%c8, %c0_10, %c0_11] : memref<10x16x12xbf16, #tpu.memory_space<vmem>>, vector<2x16x4xbf16>
    tpu.vector_store %arg8[%c8, %c0_10, %c0_11], %4 {strides = array<i32>} : memref<10x16x12xbf16, #tpu.memory_space<vmem>>, vector<2x16x4xbf16>,
    %c0_12 = arith.constant 0 : index
    %c0_13 = arith.constant 0 : index
    %c1 = arith.constant 1 : index
    %c0_14 = arith.constant 0 : index
    %6 = vector.load %arg3[%c0_12, %c0_13, %c1, %c0_14] : memref<1x8x18x4xbf16, #tpu.memory_space<vmem>>, vector<1x8x16x4xbf16>
    %7 = vector.shape_cast %6 : vector<1x8x16x4xbf16> to vector<8x16x4xbf16>
    %c0_15 = arith.constant 0 : index
    %c0_16 = arith.constant 0 : index
    %c4 = arith.constant 4 : index
    %8 = vector.load %arg8[%c0_15, %c0_16, %c4] : memref<10x16x12xbf16, #tpu.memory_space<vmem>>, vector<8x16x4xbf16>
    tpu.vector_store %arg8[%c0_15, %c0_16, %c4], %7 {strides = array<i32>} : memref<10x16x12xbf16, #tpu.memory_space<vmem>>, vector<8x16x4xbf16>,
    %c0_17 = arith.constant 0 : index
    %c0_18 = arith.constant 0 : index
    %c1_19 = arith.constant 1 : index
    %c0_20 = arith.constant 0 : index
    %9 = vector.load %arg4[%c0_17, %c0_18, %c1_19, %c0_20] : memref<1x2x18x4xbf16, #tpu.memory_space<vmem>>, vector<1x2x16x4xbf16>
    %10 = vector.shape_cast %9 : vector<1x2x16x4xbf16> to vector<2x16x4xbf16>
    %c8_21 = arith.constant 8 : index
    %c0_22 = arith.constant 0 : index
    %c4_23 = arith.constant 4 : index
    %11 = vector.load %arg8[%c8_21, %c0_22, %c4_23] : memref<10x16x12xbf16, #tpu.memory_space<vmem>>, vector<2x16x4xbf16>
    tpu.vector_store %arg8[%c8_21, %c0_22, %c4_23], %10 {strides = array<i32>} : memref<10x16x12xbf16, #tpu.memory_space<vmem>>, vector<2x16x4xbf16>,
    %c0_24 = arith.constant 0 : index
    %c0_25 = arith.constant 0 : index
    %c2 = arith.constant 2 : index
    %c0_26 = arith.constant 0 : index
    %12 = vector.load %arg3[%c0_24, %c0_25, %c2, %c0_26] : memref<1x8x18x4xbf16, #tpu.memory_space<vmem>>, vector<1x8x16x4xbf16>
    %13 = vector.shape_cast %12 : vector<1x8x16x4xbf16> to vector<8x16x4xbf16>
    %c0_27 = arith.constant 0 : index
    %c0_28 = arith.constant 0 : index
    %c8_29 = arith.constant 8 : index
    %14 = vector.load %arg8[%c0_27, %c0_28, %c8_29] : memref<10x16x12xbf16, #tpu.memory_space<vmem>>, vector<8x16x4xbf16>
    tpu.vector_store %arg8[%c0_27, %c0_28, %c8_29], %13 {strides = array<i32>} : memref<10x16x12xbf16, #tpu.memory_space<vmem>>, vector<8x16x4xbf16>,
    %c0_30 = arith.constant 0 : index
    %c0_31 = arith.constant 0 : index
    %c2_32 = arith.constant 2 : index
    %c0_33 = arith.constant 0 : index
    %15 = vector.load %arg4[%c0_30, %c0_31, %c2_32, %c0_33] : memref<1x2x18x4xbf16, #tpu.memory_space<vmem>>, vector<1x2x16x4xbf16>
    %16 = vector.shape_cast %15 : vector<1x2x16x4xbf16> to vector<2x16x4xbf16>
    %c8_34 = arith.constant 8 : index
    %c0_35 = arith.constant 0 : index
    %c8_36 = arith.constant 8 : index
    %17 = vector.load %arg8[%c8_34, %c0_35, %c8_36] : memref<10x16x12xbf16, #tpu.memory_space<vmem>>, vector<2x16x4xbf16>
    tpu.vector_store %arg8[%c8_34, %c0_35, %c8_36], %16 {strides = array<i32>} : memref<10x16x12xbf16, #tpu.memory_space<vmem>>, vector<2x16x4xbf16>,
    %c0_37 = arith.constant 0 : index
    %c0_38 = arith.constant 0 : index
    %c0_39 = arith.constant 0 : index
    %18 = vector.load %arg8[%c0_37, %c0_38, %c0_39] : memref<10x16x12xbf16, #tpu.memory_space<vmem>>, vector<8x16x12xbf16>
    %19 = vector.shape_cast %18 : vector<8x16x12xbf16> to vector<128x12xbf16>
    %c0_40 = arith.constant 0 : index
    %c0_41 = arith.constant 0 : index
    %c0_42 = arith.constant 0 : index
    %c0_43 = arith.constant 0 : index
    %20 = vector.load %arg5[%c0_40, %c0_41, %c0_42, %c0_43] : memref<2x2x12x8xbf16, #tpu.memory_space<vmem>>, vector<1x1x12x8xbf16>
    %21 = vector.shape_cast %20 : vector<1x1x12x8xbf16> to vector<12x8xbf16>
    %cst = arith.constant dense<0.000000e+00> : vector<128x8xf32>
    %22 = tpu.matmul %19, %21, %cst {dimension_numbers = #tpu.dot_dimension_numbers<[1], [0], [0], [1], [0, 0, 1, 1], [], []>} : vector<128x12xbf16>, vector<12x8xbf16>, vector<128x8xf32> -> vector<128x8xf32>
    %c1_44 = arith.constant 1 : index
    %c0_45 = arith.constant 0 : index
    %c0_46 = arith.constant 0 : index
    %23 = vector.load %arg8[%c1_44, %c0_45, %c0_46] : memref<10x16x12xbf16, #tpu.memory_space<vmem>>, vector<8x16x12xbf16>
    %24 = vector.shape_cast %23 : vector<8x16x12xbf16> to vector<128x12xbf16>
    %c0_47 = arith.constant 0 : index
    %c1_48 = arith.constant 1 : index
    %c0_49 = arith.constant 0 : index
    %c0_50 = arith.constant 0 : index
    %25 = vector.load %arg5[%c0_47, %c1_48, %c0_49, %c0_50] : memref<2x2x12x8xbf16, #tpu.memory_space<vmem>>, vector<1x1x12x8xbf16>
    %26 = vector.shape_cast %25 : vector<1x1x12x8xbf16> to vector<12x8xbf16>
    %cst_51 = arith.constant dense<0.000000e+00> : vector<128x8xf32>
    %27 = tpu.matmul %24, %26, %cst_51 {dimension_numbers = #tpu.dot_dimension_numbers<[1], [0], [0], [1], [0, 0, 1, 1], [], []>} : vector<128x12xbf16>, vector<12x8xbf16>, vector<128x8xf32> -> vector<128x8xf32>
    %28 = arith.addf %22, %27 : vector<128x8xf32>
    %c0_52 = arith.constant 0 : index
    %c0_53 = arith.constant 0 : index
    %29 = vector.load %arg6[%c0_52, %c0_53] : memref<1x8xf32, #tpu.memory_space<vmem>>, vector<1x8xf32>
    %30 = vector.broadcast %29 : vector<1x8xf32> to vector<128x8xf32>
    %31 = arith.addf %28, %30 : vector<128x8xf32>
    %32 = vector.shape_cast %31 : vector<128x8xf32> to vector<8x16x8xf32>
    %c0_54 = arith.constant 0 : index
    %c0_55 = arith.constant 0 : index
    %c0_56 = arith.constant 0 : index
    %c0_57 = arith.constant 0 : index
    %c0_58 = arith.constant 0 : index
    %33 = vector.load %arg7[%c0_54, %c0_55, %c0_56, %c0_57, %c0_58] : memref<1x8x2x16x8xf32, #tpu.memory_space<vmem>>, vector<1x8x1x16x8xf32>
    %34 = vector.shape_cast %33 : vector<1x8x1x16x8xf32> to vector<8x16x8xf32>
    %35 = vector.shape_cast %32 : vector<8x16x8xf32> to vector<1x8x1x16x8xf32>
    tpu.vector_store %arg7[%c0_54, %c0_55, %c0_56, %c0_57, %c0_58], %35 {strides = array<i32>} : memref<1x8x2x16x8xf32, #tpu.memory_space<vmem>>, vector<1x8x1x16x8xf32>,
    %c1_59 = arith.constant 1 : index
    %c0_60 = arith.constant 0 : index
    %c0_61 = arith.constant 0 : index
    %36 = vector.load %arg8[%c1_59, %c0_60, %c0_61] : memref<10x16x12xbf16, #tpu.memory_space<vmem>>, vector<8x16x12xbf16>
    %37 = vector.shape_cast %36 : vector<8x16x12xbf16> to vector<128x12xbf16>
    %c1_62 = arith.constant 1 : index
    %c0_63 = arith.constant 0 : index
    %c0_64 = arith.constant 0 : index
    %c0_65 = arith.constant 0 : index
    %38 = vector.load %arg5[%c1_62, %c0_63, %c0_64, %c0_65] : memref<2x2x12x8xbf16, #tpu.memory_space<vmem>>, vector<1x1x12x8xbf16>
    %39 = vector.shape_cast %38 : vector<1x1x12x8xbf16> to vector<12x8xbf16>
    %cst_66 = arith.constant dense<0.000000e+00> : vector<128x8xf32>
    %40 = tpu.matmul %37, %39, %cst_66 {dimension_numbers = #tpu.dot_dimension_numbers<[1], [0], [0], [1], [0, 0, 1, 1], [], []>} : vector<128x12xbf16>, vector<12x8xbf16>, vector<128x8xf32> -> vector<128x8xf32>
    %c2_67 = arith.constant 2 : index
    %c0_68 = arith.constant 0 : index
    %c0_69 = arith.constant 0 : index
    %41 = vector.load %arg8[%c2_67, %c0_68, %c0_69] : memref<10x16x12xbf16, #tpu.memory_space<vmem>>, vector<8x16x12xbf16>
    %42 = vector.shape_cast %41 : vector<8x16x12xbf16> to vector<128x12xbf16>
    %c1_70 = arith.constant 1 : index
    %c1_71 = arith.constant 1 : index
    %c0_72 = arith.constant 0 : index
    %c0_73 = arith.constant 0 : index
    %43 = vector.load %arg5[%c1_70, %c1_71, %c0_72, %c0_73] : memref<2x2x12x8xbf16, #tpu.memory_space<vmem>>, vector<1x1x12x8xbf16>
    %44 = vector.shape_cast %43 : vector<1x1x12x8xbf16> to vector<12x8xbf16>
    %cst_74 = arith.constant dense<0.000000e+00> : vector<128x8xf32>
    %45 = tpu.matmul %42, %44, %cst_74 {dimension_numbers = #tpu.dot_dimension_numbers<[1], [0], [0], [1], [0, 0, 1, 1], [], []>} : vector<128x12xbf16>, vector<12x8xbf16>, vector<128x8xf32> -> vector<128x8xf32>
    %46 = arith.addf %40, %45 : vector<128x8xf32>
    %c0_75 = arith.constant 0 : index
    %c0_76 = arith.constant 0 : index
    %47 = vector.load %arg6[%c0_75, %c0_76] : memref<1x8xf32, #tpu.memory_space<vmem>>, vector<1x8xf32>
    %48 = vector.broadcast %47 : vector<1x8xf32> to vector<128x8xf32>
    %49 = arith.addf %46, %48 : vector<128x8xf32>
    %50 = vector.shape_cast %49 : vector<128x8xf32> to vector<8x16x8xf32>
    %c0_77 = arith.constant 0 : index
    %c0_78 = arith.constant 0 : index
    %c1_79 = arith.constant 1 : index
    %c0_80 = arith.constant 0 : index
    %c0_81 = arith.constant 0 : index
    %51 = vector.load %arg7[%c0_77, %c0_78, %c1_79, %c0_80, %c0_81] : memref<1x8x2x16x8xf32, #tpu.memory_space<vmem>>, vector<1x8x1x16x8xf32>
    %52 = vector.shape_cast %51 : vector<1x8x1x16x8xf32> to vector<8x16x8xf32>
    %53 = vector.shape_cast %50 : vector<8x16x8xf32> to vector<1x8x1x16x8xf32>
    tpu.vector_store %arg7[%c0_77, %c0_78, %c1_79, %c0_80, %c0_81], %53 {strides = array<i32>} : memref<1x8x2x16x8xf32, #tpu.memory_space<vmem>>, vector<1x8x1x16x8xf32>,
    return
  }
  func.func @transform_0(%arg0: i32, %arg1: i32, %arg2: i32) -> (i32, i32, i32, i32) {
    %c0_i32 = arith.constant 0 : i32
    %c0_i32_0 = arith.constant 0 : i32
    %c0_i32_1 = arith.constant 0 : i32
    return %arg0, %arg2, %c0_i32, %c0_i32_0 : i32, i32, i32, i32
  }
  func.func @transform_1(%arg0: i32, %arg1: i32, %arg2: i32) -> (i32, i32, i32, i32) {
    %c4_i32 = arith.constant 4 : i32
    %0 = arith.muli %arg2, %c4_i32 : i32
    %c4_i32_0 = arith.constant 4 : i32
    %1 = arith.addi %0, %c4_i32_0 : i32
    %c0_i32 = arith.constant 0 : i32
    %c0_i32_1 = arith.constant 0 : i32
    %c0_i32_2 = arith.constant 0 : i32
    return %arg0, %1, %c0_i32, %c0_i32_1 : i32, i32, i32, i32
  }
  func.func @transform_2(%arg0: i32, %arg1: i32, %arg2: i32) -> (i32, i32, i32, i32) {
    %c0_i32 = arith.constant 0 : i32
    %c0_i32_0 = arith.constant 0 : i32
    %c0_i32_1 = arith.constant 0 : i32
    %c0_i32_2 = arith.constant 0 : i32
    return %c0_i32, %c0_i32_0, %c0_i32_1, %arg1 : i32, i32, i32, i32
  }
  func.func @transform_3(%arg0: i32, %arg1: i32, %arg2: i32) -> (i32, i32) {
    %c0_i32 = arith.constant 0 : i32
    %c0_i32_0 = arith.constant 0 : i32
    return %c0_i32, %arg1 : i32, i32
  }
  func.func @transform_4(%arg0: i32, %arg1: i32, %arg2: i32) -> (i32, i32, i32, i32, i32) {
    %c0_i32 = arith.constant 0 : i32
    %c0_i32_0 = arith.constant 0 : i32
    %c0_i32_1 = arith.constant 0 : i32
    return %arg0, %arg2, %c0_i32, %c0_i32_0, %arg1 : i32, i32, i32, i32, i32
  }
}

</mosaic_0001>

<bundles_post_ra>
// kernel: tpu_custom_call.1
= control target key start
LH: loop header
LB: loop body
LE: loop exit
PB: predicated region body
PF: predicated region fallthrough
CT: control target
= control target key end

     0   :  { %s2357_s15 = smov 0   ;;  %s2359_s16 = smov 0   ;;  %s2916_s0 = inlined_call_operand.vmem [shape: bf16[2,18,18,4], index: 0, kind: input, shape index: {}]   ;;  %s2917_s1 = inlined_call_operand.vmem [shape: bf16[2,18,18,4], index: 1, kind: input, shape index: {}]   ;;  %s2918_s2 = inlined_call_operand.vmem [shape: bf16[2,2,12,8], index: 2, kind: input, shape index: {}]   ;;  %s2919_s3 = inlined_call_operand.vmem [shape: f32[1,8], index: 3, kind: input, shape index: {}]   ;;  %s2920_s4 = inlined_call_operand.vmem [shape: f32[2,16,2,16,8], index: 4, kind: output, shape index: {}]  }
   0x1   :  { %s2361_s17 = smov 0   ;;  %s2363_s18 = smov 0  }
   0x2   :  { %s2365_s19 = smov 0  }
   0x3 LB: > { %s26_s20 = sadd.s32 1, %s2320_s17  ;;  %s33_s21 = sadd.s32 1, %s2324_s18  ;;  %s2328_s19 = sphi %s2365_s19, %s14_s19   ;;  %s2324_s18 = sphi %s2363_s18, %s2929_s18   ;;  %s2320_s17 = sphi %s2361_s17, %s2928_s17   ;;  %s2316_s16 = sphi %s2359_s16, %s2927_s16   ;;  %s2312_s15 = sphi %s2357_s15, %s2926_s15  }
   0x4   : > { %p27_p0 = scmp.ge.s32.totalorder %s26_s20, 2  ;;  %p1980_p1 = scmp.ge.s32.totalorder %s2328_s19, 1 }
   0x5   : > { %p246_p2 = scmp.lt.s32.totalorder %s2328_s19, 5 }
   0x6   : > { %s2931_s20 = smov (%p27_p0, %s26_s20), 0  ;;  %s2933_s21 = smov (!%p27_p0, %s33_s21), %s2324_s18 }
   0x7   : > { %p247_p3 = pnand %p1980_p1, %p246_p2  ;;  %p35_p4 = scmp.ge.s32.totalorder %s2933_s21, 2 }
   0x8   : > { %s2387_s22 = sshll.u32 (!%p247_p3), %s2312_s15, 3  ;;  %p315_p5 = scmp.lt.s32.totalorder (!%p247_p3), %s2316_s16, 1 }
   0x9   : > { %s2935_s21 = smov (%p35_p4, %s2933_s21), 0  ;;  %250 = sbr.rel (%p247_p3) target bundleno = 455 (0x1c7), region = 36 }
   0xa   : > { %p317_p6 = scmp.lt.s32.totalorder (!%p247_p3), %s2387_s22, 17  ;;  %s2330_s5 = smov (!%p247_p3), 8  }
   0xb   : > { %s2331_s6 = smov (!%p247_p3), 4   ;;  %s2095_s7 = sadd.s32 (!%p247_p3), 8, %s2387_s22 }
   0xc   : > { %p2465_p7 = scmp.lt.s32.totalorder (!%p247_p3), %s2095_s7, 17  ;;  %p355_p8 = scmp.lt.s32.totalorder (!%p247_p3), %s2387_s22, 15 }
   0xe   : > { %s2937_s16 = smov (!%p315_p5, %s2316_s16), 1  ;;  %vm811_vm0 = vcmask 1042432   ;;  %vm812_vm1 = vcmask 1046532   ;;  %vm433_vm3 = vsmask.f32 3328  ;;  %s2939_s7 = smov (!%p2465_p7, %s2095_s7), 17 }
   0xf   : > { %s318_s23 = scalar_select %p317_p6, %s2387_s22, 17  ;;  %vm2401_vm2 = vmor %vm811_vm0, %vm812_vm1  ;;  %vm434_vm4 = vsmask.f32 7440  ;;  %vm383_vm6 = vcmask 27648   ;;  %vm1085_vm7 = vcmask 1045504   ;;  %vm676_vm8 = vcmask 60448  }
  0x10   : > { %s2210_s24 = smul.u32 54, %s2937_s16  ;;  %vm2439_vm5 = vmor %vm433_vm3, %vm434_vm4  ;;  %vm918_vm9 = vcmask 93248   ;;  %vm1060_vm10 = vcmask 97280   ;;  %s2941_s22 = smov (!%p355_p8, %s2387_s22), 15  ;;  %vm1378_vm11 = vcmask 64512  }
  0x11   : > { %s2209_s25 = smul.u32 3, %s318_s23 }
  0x12   : > { %s2211_s9 = smul.u32 3, %s2939_s7 }
  0x13   : > { %s321_s26 = sadd.s32 %s2210_s24, %s2209_s25 }
  0x14   : > { %s1982_s27 = sshll.u32 %s321_s26, 2  ;;  %s2510_s10 = sadd.s32 %s2211_s9, %s2210_s24 }
  0x15   : > { %s2399_s30 = scalar_lea.vmem %s2916_s0, %s1982_s27  ;;  %s1985_s11 = sshll.u32 %s2510_s10, 2 }
  0x16   : > { %v763_v1 = vld [vmem:[%s2399_s30] sm:$0xe]  ;;  %v764_v2 = vld [vmem:[%s2399_s30 + $0x4] sm:$0xf]  ;;  %v765_v3 = vld [vmem:[%s2399_s30 + $0x8] sm:$0x1]  ;;  %s2533_s14 = scalar_lea.vmem %s2917_s1, %s1985_s11 }
  0x17   : > { %v1990_v4 = vrot.slane %v763_v1, 9  ;;  %v816_v5 = vrot.slane %v764_v2, 5  ;;  %v819_v6 = vrot.slane %v765_v3, 5  ;;  %v766_v7 = vld [vmem:[%s2399_s30 + $0xc] sm:$0xe] }
  0x18   : > { %v767_v8 = vld [vmem:[%s2399_s30 + $0x10] sm:$0xf]  ;;  %v1991_v9 = vrot.slane %v766_v7, 9  ;;  %v768_v10 = vld [vmem:[%s2399_s30 + $0x14] sm:$0x1] }
  0x19   : > { %v817_v11 = vsel %vm2401_vm2, %v1990_v4, %v816_v5  ;;  %v818_v12 = vrot.slane %v816_v5, 4  ;;  %v823_v13 = vrot.slane %v767_v8, 5  ;;  %v826_v14 = vrot.slane %v768_v10, 5  ;;  %v769_v15 = vld [vmem:[%s2399_s30 + $0x18] sm:$0xe] }
  0x1a   : > { %870 = vrot.lane.b32.xlu0 %v817_v11, %s2330_s5  ;;  %v770_v16 = vld [vmem:[%s2399_s30 + $0x1c] sm:$0xf]  ;;  %v1992_v17 = vrot.slane %v769_v15, 9  ;;  %v771_v18 = vld [vmem:[%s2399_s30 + $0x20] sm:$0x1] }
  0x1b   : > { %v820_v19 = vsel %vm2401_vm2, %v818_v12, %v819_v6  ;;  %v824_v20 = vsel %vm2401_vm2, %v1991_v9, %v823_v13  ;;  %v825_v21 = vrot.slane %v823_v13, 4  ;;  %v830_v22 = vrot.slane %v770_v16, 5  ;;  %v409_v23 = vld [vmem:[%s2399_s30] sm:$0xf]  ;;  %v410_v24 = vld [vmem:[%s2399_s30 + $0x4] sm:$0xf] }
  0x1c   : > { %872 = vrot.lane.b32.xlu1 %v820_v19, %s2330_s5  ;;  %v833_v25 = vrot.slane %v771_v18, 5  ;;  %v437_v26 = vshrl.u32 %v409_v23, 16  ;;  %v440_v27 = vshll.u32 %v409_v23, 16  ;;  %v446_v28 = vshll.u32 %v410_v24, 16  ;;  %v412_v29 = vld [vmem:[%s2399_s30 + $0xc] sm:$0xf] }
  0x1d   : > { %v827_v30 = vsel %vm2401_vm2, %v825_v21, %v826_v14  ;;  %v831_v31 = vsel %vm2401_vm2, %v1992_v17, %v830_v22  ;;  %v832_v32 = vrot.slane %v830_v22, 4  ;;  %v450_v33 = vshrl.u32 %v410_v24, 16  ;;  %v413_v34 = vld [vmem:[%s2399_s30 + $0x10] sm:$0xf]  ;;  %v411_v35 = vld [vmem:[%s2399_s30 + $0x8] sm:$0x1] }
  0x1e   : > { %874 = vrot.lane.b32.xlu0 %v824_v20, %s2330_s5  ;;  %v439_v36 = vrot.slane %v437_v26, 4  ;;  %v442_v37 = vrot.slane %v440_v27, 5  ;;  %v448_v38 = vrot.slane %v446_v28, 5  ;;  %v461_v39 = vshrl.u32 %v412_v29, 16  ;;  %v414_v40 = vld [vmem:[%s2399_s30 + $0x14] sm:$0x1] }
  0x1f   : > { %v834_v41 = vsel %vm2401_vm2, %v832_v32, %v833_v25  ;;  %v464_v42 = vshll.u32 %v412_v29, 16  ;;  %v470_v43 = vshll.u32 %v413_v34, 16  ;;  %v474_v44 = vshrl.u32 %v413_v34, 16  ;;  %v415_v45 = vld [vmem:[%s2399_s30 + $0x18] sm:$0xf] }
  0x20   : > { %876 = vrot.lane.b32.xlu1 %v827_v30, %s2330_s5  ;;  %v443_v46 = vor.u32 %v442_v37, %v439_v36  ;;  %v463_v47 = vrot.slane %v461_v39, 4  ;;  %v452_v48 = vrot.slane %v450_v33, 4  ;;  %v456_v49 = vshll.u32 %v411_v35, 16  ;;  %v416_v55 = vld [vmem:[%s2399_s30 + $0x1c] sm:$0xf] }
  0x21   : > { %v466_v51 = vrot.slane %v464_v42, 5  ;;  %v472_v52 = vrot.slane %v470_v43, 5  ;;  %v476_v53 = vrot.slane %v474_v44, 4  ;;  %v480_v54 = vshll.u32 %v414_v40, 16  ;;  %v417_v1 = vld [vmem:[%s2399_s30 + $0x20] sm:$0x1] }
  0x22   : > { %878 = vrot.lane.b32.xlu0 %v831_v31, %s2330_s5  ;;  %v444_v56 = vrot.slane %v443_v46, 4  ;;  %v453_v57 = vor.u32 %v452_v48, %v448_v38  ;;  %v458_v58 = vrot.slane %v456_v49, 5  ;;  %v485_v59 = vshrl.u32 %v415_v45, 16  ;;  %v419_v2 = vld [vmem:[%s2399_s30 + $0x28] sm:$0xf] }
  0x23   : > { %v467_v60 = vor.u32 %v466_v51, %v463_v47  ;;  %v477_v61 = vor.u32 %v476_v53, %v472_v52  ;;  %v482_v62 = vrot.slane %v480_v54, 5  ;;  %v488_v63 = vshll.u32 %v415_v45, 16  ;;  %v420_v11 = vld [vmem:[%s2399_s30 + $0x2c] sm:$0x1]  ;;  %v418_v16 = vld [vmem:[%s2399_s30 + $0x24] sm:$0xf] }
  0x24   : > { %880 = vrot.lane.b32.xlu1 %v834_v41, %s2330_s5  ;;  %v449_v3 = vsel %vm2439_vm5, %v444_v56, %v448_v38  ;;  %v454_v4 = vrot.slane %v453_v57, 4  ;;  %v487_v5 = vrot.slane %v485_v59, 4  ;;  %v494_v6 = vshll.u32 %v416_v55, 16  ;;  %v422_v21 = vld [vmem:[%s2399_s30 + $0x34] sm:$0xf] }
  0x25   : > { %v468_v7 = vrot.slane %v467_v60, 4  ;;  %v478_v8 = vrot.slane %v477_v61, 4  ;;  %v490_v9 = vrot.slane %v488_v63, 5  ;;  %v498_v10 = vshrl.u32 %v416_v55, 16  ;;  %v423_v30 = vld [vmem:[%s2399_s30 + $0x38] sm:$0x1] }
  0x26   : > { %628 = vrot.lane.b32.xlu0 %v449_v3, %s2331_s6  ;;  %v459_v12 = vsel %vm2439_vm5, %v454_v4, %v458_v58  ;;  %v496_v13 = vrot.slane %v494_v6, 5  ;;  %v504_v14 = vshll.u32 %v417_v1, 16  ;;  %v518_v15 = vshll.u32 %v419_v2, 16  ;;  %v421_v35 = vld [vmem:[%s2399_s30 + $0x30] sm:$0xf] }
  0x27   : > { %v473_v17 = vsel %vm2439_vm5, %v468_v7, %v472_v52  ;;  %v483_v18 = vsel %vm2439_vm5, %v478_v8, %v482_v62  ;;  %v491_v19 = vor.u32 %v490_v9, %v487_v5  ;;  %v500_v20 = vrot.slane %v498_v10, 4  ;;  %v773_v40 = vld [vmem:[%s2399_s30 + $0x28] sm:$0xf]  ;;  %v774_v52 = vld [vmem:[%s2399_s30 + $0x2c] sm:$0x1] }
  0x28   : > { %632 = vrot.lane.b32.xlu1 %v473_v17, %s2331_s6  ;;  %v506_v22 = vrot.slane %v504_v14, 5  ;;  %v520_v23 = vrot.slane %v518_v15, 5  ;;  %v522_v24 = vshrl.u32 %v419_v2, 16  ;;  %v528_v25 = vshll.u32 %v420_v11, 16  ;;  %v772_v57 = vld [vmem:[%s2399_s30 + $0x24] sm:$0xe] }
  0x29   : > { %v492_v26 = vrot.slane %v491_v19, 4  ;;  %v501_v27 = vor.u32 %v500_v20, %v496_v13  ;;  %v509_v28 = vshrl.u32 %v418_v16, 16  ;;  %v512_v29 = vshll.u32 %v418_v16, 16  ;;  %v776_v59 = vld [vmem:[%s2399_s30 + $0x34] sm:$0xf] }
  0x2a   : > { %630 = vrot.lane.b32.xlu0 %v459_v12, %s2331_s6  ;;  %v524_v31 = vrot.slane %v522_v24, 4  ;;  %v530_v32 = vrot.slane %v528_v25, 5  ;;  %v542_v33 = vshll.u32 %v422_v21, 16  ;;  %v546_v34 = vshrl.u32 %v422_v21, 16  ;;  %v425_v60 = vld [vmem:[%s2399_s30 + $0x40] sm:$0xf] }
  0x2b   : > { %v497_v36 = vsel %vm2439_vm5, %v492_v26, %v496_v13  ;;  %v502_v37 = vrot.slane %v501_v27, 4  ;;  %v511_v38 = vrot.slane %v509_v28, 4  ;;  %v514_v39 = vrot.slane %v512_v29, 5  ;;  %v777_v2 = vld [vmem:[%s2399_s30 + $0x38] sm:$0x1] }
  0x2c   : > { %634 = vrot.lane.b32.xlu1 %v483_v18, %s2331_s6  ;;  %v525_v41 = vor.u32 %v524_v31, %v520_v23  ;;  %v544_v42 = vrot.slane %v542_v33, 5  ;;  %v548_v43 = vrot.slane %v546_v34, 4  ;;  %v552_v44 = vshll.u32 %v423_v30, 16  ;;  %v424_v3 = vld [vmem:[%s2399_s30 + $0x3c] sm:$0xf] }
  0x2d   : > { %v507_v45 = vsel %vm2439_vm5, %v502_v37, %v506_v22  ;;  %v515_v46 = vor.u32 %v514_v39, %v511_v38  ;;  %v533_v47 = vshrl.u32 %v421_v35, 16  ;;  %v536_v48 = vshll.u32 %v421_v35, 16  ;;  %v775_v6 = vld [vmem:[%s2399_s30 + $0x30] sm:$0xe]  ;;  %v428_v11 = vld [vmem:[%s2399_s30 + $0x4c] sm:$0xf] }
  0x2e   : > { %636 = vrot.lane.b32.xlu0 %v497_v36, %s2331_s6  ;;  %v526_v49 = vrot.slane %v525_v41, 4  ;;  %v549_v51 = vor.u32 %v548_v43, %v544_v42  ;;  %v837_v53 = vrot.slane %v773_v40, 5  ;;  %v554_v58 = vrot.slane %v552_v44, 5  ;;  %v427_v16 = vld [vmem:[%s2399_s30 + $0x48] sm:$0xf] }
  0x2f   : > { %v516_v54 = vrot.slane %v515_v46, 4  ;;  %v535_v55 = vrot.slane %v533_v47, 4  ;;  %v538_v56 = vrot.slane %v536_v48, 5  ;;  %v840_v5 = vrot.slane %v774_v52, 5  ;;  %v426_v19 = vld [vmem:[%s2399_s30 + $0x44] sm:$0x1] }
  0x30   : > { %638 = vrot.lane.b32.xlu1 %v507_v45, %s2331_s6  ;;  %v531_v61 = vsel %vm2439_vm5, %v526_v49, %v530_v32  ;;  %v550_v63 = vrot.slane %v549_v51, 4  ;;  %v839_v4 = vrot.slane %v837_v53, 4  ;;  %v1993_v8 = vrot.slane %v772_v57, 9  ;;  %v429_v25 = vld [vmem:[%s2399_s30 + $0x50] sm:$0x1] }
  0x31   : > { %v521_v62 = vsel %vm2439_vm5, %v516_v54, %v520_v23  ;;  %v539_v1 = vor.u32 %v538_v56, %v535_v55  ;;  %v566_v9 = vshll.u32 %v425_v60, 16  ;;  %v570_v10 = vshrl.u32 %v425_v60, 16  ;;  %v2519_v31 = vld [vmem:[%s2399_s30 + $0x40] sm:$0xf]  ;;  %v431_v48 = vld [vmem:[%s2399_s30 + $0x58] sm:$0xf] }
  0x32   : > { %640 = vrot.lane.b32.xlu0 %v521_v62, %s2331_s6  ;;  %v844_v12 = vrot.slane %v776_v59, 5  ;;  %v847_v13 = vrot.slane %v777_v2, 5  ;;  %v557_v14 = vshrl.u32 %v424_v3, 16  ;;  %v560_v15 = vshll.u32 %v424_v3, 16  ;;  %v430_v49 = vld [vmem:[%s2399_s30 + $0x54] sm:$0xf] }
  0x33   : > { %v540_v7 = vrot.slane %v539_v1, 4  ;;  %v555_v17 = vsel %vm2439_vm5, %v550_v63, %v554_v58  ;;  %v2506_v20 = vrot.slane %v566_v9, 5  ;;  %v572_v21 = vrot.slane %v570_v10, 4  ;;  %v778_v54 = vld [vmem:[%s2399_s30 + $0x3c] sm:$0xe] }
  0x34   : > { %642 = vrot.lane.b32.xlu1 %v531_v61, %s2331_s6  ;;  %v841_v22 = vsel %vm2401_vm2, %v839_v4, %v840_v5  ;;  %v559_v23 = vrot.slane %v557_v14, 4  ;;  %v562_v24 = vrot.slane %v560_v15, 5  ;;  %v590_v26 = vshll.u32 %v428_v11, 16  ;;  %v2549_v57 = vld [vmem:[%s2399_s30 + $0x4c] sm:$0xf] }
  0x35   : > { %v545_v18 = vsel %vm2439_vm5, %v540_v7, %v544_v42  ;;  %v838_v27 = vsel %vm2401_vm2, %v1993_v8, %v837_v53  ;;  %v1994_v28 = vrot.slane %v775_v6, 9  ;;  %v594_v29 = vshrl.u32 %v428_v11, 16  ;;  %v2542_v53 = vld [vmem:[%s2399_s30 + $0x44] sm:$0x1]  ;;  %v693_v63 = vld [vmem:[%s2533_s14] sm:$0xf] }
  0x36   : > { %644 = vrot.lane.b32.xlu0 %v545_v18, %s2331_s6  ;;  %v581_v30 = vshrl.u32 %v427_v16, 16  ;;  %v573_v32 = vor.u32 %v572_v21, %v2506_v20  ;;  %v576_v33 = vshll.u32 %v426_v19, 16  ;;  %v563_v34 = vor.u32 %v562_v24, %v559_v23  ;;  %v694_v58 = vld [vmem:[%s2533_s14 + $0x4] sm:$0xf]  ;;  %v785_v5 = vld [vmem:[%s2399_s30 + $0x58] sm:$0xf] }
  0x37   : > { %v584_v35 = vshll.u32 %v427_v16, 16  ;;  %v846_v36 = vrot.slane %v844_v12, 4  ;;  %v2524_v37 = vrot.slane %v590_v26, 5  ;;  %v596_v38 = vrot.slane %v594_v29, 4  ;;  %v786_v10 = vld [vmem:[%s2399_s30 + $0x5c] sm:$0x1] }
  0x38   : > { %646 = vrot.lane.b32.xlu1 %v555_v17, %s2331_s6  ;;  %v583_v39 = vrot.slane %v581_v30, 4  ;;  %v600_v40 = vshll.u32 %v429_v25, 16  ;;  %v851_v42 = vrot.slane %v2519_v31, 5  ;;  %v845_v43 = vsel %vm2401_vm2, %v1994_v28, %v844_v12  ;;  %v781_v12 = vld [vmem:[%s2399_s30 + $0x48] sm:$0xe] }
  0x39   : > { %v586_v41 = vrot.slane %v584_v35, 5  ;;  %v564_v44 = vrot.slane %v563_v34, 4  ;;  %v574_v45 = vrot.slane %v573_v32, 4  ;;  %v578_v46 = vrot.slane %v576_v33, 5  ;;  %v784_v16 = vld [vmem:[%s2399_s30 + $0x54] sm:$0xe] }
  0x3a   : > { %882 = vrot.lane.b32.xlu0 %v838_v27, %s2330_s5  ;;  %v848_v51 = vsel %vm2401_vm2, %v846_v36, %v847_v13  ;;  %v597_v52 = vor.u32 %v596_v38, %v2524_v37  ;;  %v602_v55 = vrot.slane %v600_v40, 5  ;;  %v853_v56 = vrot.slane %v851_v42, 4  ;;  %v783_v18 = vld [vmem:[%s2399_s30 + $0x50] sm:$0x1]  ;;  %v432_v23 = vld [vmem:[%s2399_s30 + $0x5c] sm:$0x1] }
  0x3b   : > { %v587_v47 = vor.u32 %v586_v41, %v583_v39  ;;  %v569_v59 = vsel %vm2439_vm5, %v564_v44, %v2506_v20  ;;  %v614_v61 = vshll.u32 %v431_v48, 16  ;;  %v605_v62 = vshrl.u32 %v430_v49, 16  ;;  %v695_v25 = vld [vmem:[%s2533_s14 + $0x8] sm:$0x1]  ;;  %v369_v29 = vld [vmem:[%s2399_s30 + $0xc] sm:$0xf] }
  0x3c   : > { %884 = vrot.lane.b32.xlu1 %v841_v22, %s2330_s5  ;;  %v579_v1 = vsel %vm2439_vm5, %v574_v45, %v578_v46  ;;  %v854_v2 = vrot.slane %v2542_v53, 5  ;;  %v1995_v3 = vrot.slane %v778_v54, 9  ;;  %v618_v4 = vshrl.u32 %v431_v48, 16  ;;  %v367_v22 = vld [vmem:[%s2399_s30] sm:$0xf] }
  0x3d   : > { %v588_v60 = vrot.slane %v587_v47, 4  ;;  %v598_v6 = vrot.slane %v597_v52, 4  ;;  %v608_v7 = vshll.u32 %v430_v49, 16  ;;  %v709_v8 = vshll.u32 %v694_v58, 16  ;;  %384 = vst.msk [vmem:[#allocation2] sm:$0xf] %vm383_vm6, %v367_v22 }
  0x3e   : > { %886 = vrot.lane.b32.xlu0 %v845_v43, %s2330_s5  ;;  %v713_v9 = vshrl.u32 %v694_v58, 16  ;;  %v858_v11 = vrot.slane %v2549_v57, 5  ;;  %v607_v13 = vrot.slane %v605_v62, 4  ;;  %v700_v14 = vshrl.u32 %v693_v63, 16  ;;  %386 = vst.msk [vmem:[#allocation2 + $0x8] sm:$0xf] %vm383_vm6, %v369_v29 }
  0x3f   : > { %v703_v15 = vshll.u32 %v693_v63, 16  ;;  %v593_v17 = vsel %vm2439_vm5, %v588_v60, %v2524_v37  ;;  %v2570_v19 = vrot.slane %v614_v61, 5  ;;  %v610_v20 = vrot.slane %v608_v7, 5  ;;  %v368_v34 = vld [vmem:[%s2399_s30 + $0x4] sm:$0xf] }
  0x40   : > { %888 = vrot.lane.b32.xlu1 %v848_v51, %s2330_s5  ;;  %v865_v21 = vrot.slane %v785_v5, 5  ;;  %v620_v24 = vrot.slane %v618_v4, 4  ;;  %v2576_v26 = vrot.slane %v709_v8, 5  ;;  %v715_v27 = vrot.slane %v713_v9, 4  ;;  %v370_v35 = vld [vmem:[%s2399_s30 + $0x10] sm:$0xf] }
  0x41   : > { %v702_v28 = vrot.slane %v700_v14, 4  ;;  %v603_v30 = vsel %vm2439_vm5, %v598_v6, %v602_v55  ;;  %v868_v33 = vrot.slane %v786_v10, 5  ;;  %v611_v36 = vor.u32 %v610_v20, %v607_v13  ;;  %385 = vst.msk [vmem:[#allocation2 + $0x4] sm:$0xf] %vm383_vm6, %v368_v34  ;;  %387 = vst.msk [vmem:[#allocation2 + $0xc] sm:$0xf] %vm383_vm6, %v370_v35 }
  0x42   : > { %648 = vrot.lane.b32.xlu0 %v569_v59, %s2331_s6  ;;  %v867_v32 = vrot.slane %v865_v21, 4  ;;  %v705_v37 = vrot.slane %v703_v15, 5  ;;  %v1997_v38 = vrot.slane %v784_v16, 9  ;;  %v371_v39 = vld [vmem:[%s2399_s30 + $0x18] sm:$0xf]  ;;  %v852_v41 = vsel %vm2401_vm2, %v1995_v3, %v851_v42 }
  0x43   : > { %v372_v40 = vld [vmem:[%s2399_s30 + $0x1c] sm:$0xf]  ;;  %v1996_v43 = vrot.slane %v781_v12, 9  ;;  %388 = vst.msk [vmem:[#allocation2 + $0x10] sm:$0xf] %vm383_vm6, %v371_v39  ;;  %v855_v45 = vsel %vm2401_vm2, %v853_v56, %v854_v2  ;;  %v860_v31 = vrot.slane %v858_v11, 4  ;;  %v621_v48 = vor.u32 %v620_v24, %v2570_v19 }
  0x44   : > { %650 = vrot.lane.b32.xlu1 %v579_v1, %s2331_s6  ;;  %v2596_v44 = vsel %vm2401_vm2, %v867_v32, %v868_v33  ;;  %389 = vst.msk [vmem:[#allocation2 + $0x14] sm:$0xf] %vm383_vm6, %v372_v40  ;;  %v861_v46 = vrot.slane %v783_v18, 5  ;;  %v2605_v42 = vsel %vm2401_vm2, %v1997_v38, %v865_v21  ;;  %v374_v47 = vld [vmem:[%s2399_s30 + $0x28] sm:$0xf]  ;;  %v624_v49 = vshll.u32 %v432_v23, 16 }
  0x45   : > { %v716_v51 = vor.u32 %v715_v27, %v2576_v26  ;;  %v719_v52 = vshll.u32 %v695_v25, 16  ;;  %v2611_v53 = vld [vmem:[%s2533_s14 + $0x10] sm:$0xf]  ;;  %391 = vst.msk [vmem:[#allocation2 + $0x1c] sm:$0xf] %vm383_vm6, %v374_v47  ;;  %v612_v55 = vrot.slane %v611_v36, 4  ;;  %v706_v56 = vor.u32 %v705_v37, %v702_v28 }
  0x46   : > { %652 = vrot.lane.b32.xlu0 %v593_v17, %s2331_s6  ;;  %v373_v54 = vld [vmem:[%s2399_s30 + $0x24] sm:$0xf]  ;;  %v376_v57 = vld [vmem:[%s2399_s30 + $0x34] sm:$0xf]  ;;  %v375_v58 = vld [vmem:[%s2399_s30 + $0x30] sm:$0xf]  ;;  %v859_v59 = vsel %vm2401_vm2, %v1996_v43, %v858_v11  ;;  %v862_v63 = vsel %vm2401_vm2, %v860_v31, %v861_v46 }
  0x47   : > { %390 = vst.msk [vmem:[#allocation2 + $0x18] sm:$0xf] %vm383_vm6, %v373_v54  ;;  %v2254_v60 = vld [vmem:[%s2918_s2] sm:$0x3f]   ;;  %v2256_v61 = vld [vmem:[%s2918_s2 + $0x8] sm:$0x3f]   ;;  %v617_v8 = vsel %vm2439_vm5, %v612_v55, %v2570_v19 }
  0x48   : > { %654 = vrot.lane.b32.xlu1 %v603_v30, %s2331_s6  ;;  %393 = vst.msk [vmem:[#allocation2 + $0x24] sm:$0xf] %vm383_vm6, %v376_v57  ;;  %392 = vst.msk [vmem:[#allocation2 + $0x20] sm:$0xf] %vm383_vm6, %v375_v58  ;;  %v378_v62 = vld [vmem:[%s2399_s30 + $0x40] sm:$0xf]  ;;  %2206 = vmatprep.subr.msk.bf16.mxu1 %vm1085_vm7, %v2254_v60 }
  0x49   : > { %v696_v1 = vld [vmem:[%s2533_s14 + $0xc] sm:$0xf]  ;;  %395 = vst.msk [vmem:[#allocation2 + $0x2c] sm:$0xf] %vm383_vm6, %v378_v62  ;;  %v377_v2 = vld [vmem:[%s2399_s30 + $0x3c] sm:$0xf]  ;;  %2205 = vmatprep.subr.msk.bf16.mxu0 %vm1085_vm7, %v2256_v61 }
  0x4a   : > { %890 = vrot.lane.b32.xlu0 %v852_v41, %s2330_s5  ;;  %v622_v3 = vrot.slane %v621_v48, 4  ;;  %v626_v4 = vrot.slane %v624_v49, 5  ;;  %v717_v5 = vrot.slane %v716_v51, 4  ;;  %v721_v6 = vrot.slane %v719_v52, 5  ;;  %394 = vst.msk [vmem:[#allocation2 + $0x28] sm:$0xf] %vm383_vm6, %v377_v2 }
  0x4b   : > { %v380_v7 = vld [vmem:[%s2399_s30 + $0x4c] sm:$0xf]  ;;  %v707_v9 = vrot.slane %v706_v56, 4  ;;  %v733_v10 = vshll.u32 %v2611_v53, 16  ;;  %v379_v11 = vld [vmem:[%s2399_s30 + $0x48] sm:$0xf] }
  0x4c   : > { %892 = vrot.lane.b32.xlu1 %v855_v45, %s2330_s5  ;;  %397 = vst.msk [vmem:[#allocation2 + $0x34] sm:$0xf] %vm383_vm6, %v380_v7  ;;  %v724_v12 = vshrl.u32 %v696_v1, 16  ;;  %v727_v13 = vshll.u32 %v696_v1, 16  ;;  %v1256_v14 = vsel %vm1085_vm7, %v2254_v60, 0  ;;  %v1087_v15 = vsel %vm1085_vm7, %v2256_v61, 0 }
  0x4d   : > { %396 = vst.msk [vmem:[#allocation2 + $0x30] sm:$0xf] %vm383_vm6, %v379_v11  ;;  %v2265_v16 = vld [vmem:[%s2918_s2 + $0x18] sm:$0x3f]   ;;  %2152 = vmatpush3.bf16.msra.mxu1 %v1256_v14  ;;  %v2266_v17 = vld [vmem:[%s2918_s2 + $0x10] sm:$0x3f]   ;;  %v627_v20 = vsel %vm2439_vm5, %v622_v3, %v626_v4  ;;  %2134 = vmatpush3.bf16.msra.mxu0 %v1087_v15  ;;  %v712_v28 = vsel %vm2439_vm5, %v707_v9, %v2576_v26 }
  0x4e   : > { %894 = vrot.lane.b32.xlu0 %v859_v59, %s2330_s5  ;;  %v382_v18 = vld [vmem:[%s2399_s30 + $0x58] sm:$0xf]  ;;  %v381_v19 = vld [vmem:[%s2399_s30 + $0x54] sm:$0xf]  ;;  %v737_v21 = vshrl.u32 %v2611_v53, 16  ;;  %v2663_v22 = vsel %vm1085_vm7, %v2265_v16, 0  ;;  %2207 = vmatprep.subr.msk.bf16.mxu0 %vm1085_vm7, %v2265_v16  ;;  %v722_v33 = vsel %vm2439_vm5, %v717_v5, %v721_v6 }
  0x4f   : > { %399 = vst.msk [vmem:[#allocation2 + $0x3c] sm:$0xf] %vm383_vm6, %v382_v18  ;;  %398 = vst.msk [vmem:[#allocation2 + $0x38] sm:$0xf] %vm383_vm6, %v381_v19  ;;  %v401_v23 = vld [vmem:[%s2533_s14 + $0x4] sm:$0xf]  ;;  %2208 = vmatprep.subr.msk.bf16.mxu1 %vm1085_vm7, %v2266_v17 }
  0x50   : > { %896 = vrot.lane.b32.xlu1 %v862_v63, %s2330_s5  ;;  %v400_v24 = vld [vmem:[%s2533_s14] sm:$0xf]  ;;  %v936_v25 = vld [vmem:[%s2533_s14 + $0x4] sm:$0xf]  ;;  %v2673_v27 = vsel %vm1085_vm7, %v2266_v17, 0  ;;  %v726_v29 = vrot.slane %v724_v12, 4 }
  0x51   : > { %406 = vst.msk [vmem:[#allocation2 + $0x44] sm:$0xf] %vm383_vm6, %v401_v23  ;;  %405 = vst.msk [vmem:[#allocation2 + $0x40] sm:$0xf] %vm383_vm6, %v400_v24  ;;  %v729_v30 = vrot.slane %v727_v13, 5  ;;  %v949_v34 = vrot.slane %v936_v25, 5 }
  0x52   : > { %656 = vrot.lane.b32.xlu0 %v617_v8, %s2331_s6  ;;  %v935_v32 = vld [vmem:[%s2533_s14] sm:$0xe]  ;;  %v735_v35 = vrot.slane %v733_v10, 5  ;;  %v739_v36 = vrot.slane %v737_v21, 4  ;;  %v937_v37 = vld [vmem:[%s2533_s14 + $0x8] sm:$0x1] }
  0x53   : > { %v698_v38 = vld [vmem:[%s2533_s14 + $0x14] sm:$0x1]  ;;  %v1998_v26 = vrot.slane %v935_v32, 9  ;;  %v730_v39 = vor.u32 %v729_v30, %v726_v29  ;;  %v951_v40 = vrot.slane %v949_v34, 4  ;;  %v952_v41 = vrot.slane %v937_v37, 5  ;;  %s1987_s30 = sshll.u32 %s2941_s22, 2 }
  0x54   : > { %658 = vrot.lane.b32.xlu1 %v627_v20, %s2331_s6  ;;  %v740_v43 = vor.u32 %v739_v36, %v735_v35  ;;  %v743_v45 = vshll.u32 %v698_v38, 16  ;;  %v939_v31 = vld [vmem:[%s2533_s14 + $0x10] sm:$0xf]  ;;  %v938_v48 = vld [vmem:[%s2533_s14 + $0xc] sm:$0xe] }
  0x55   : > { %v950_v46 = vsel %vm2401_vm2, %v1998_v26, %v949_v34  ;;  %v731_v47 = vrot.slane %v730_v39, 4  ;;  %v953_v49 = vsel %vm2401_vm2, %v951_v40, %v952_v41  ;;  %v956_v53 = vrot.slane %v939_v31, 5  ;;  %v403_v60 = vld [vmem:[%s2533_s14 + $0x10] sm:$0xf]  ;;  %v402_v61 = vld [vmem:[%s2533_s14 + $0xc] sm:$0xf] }
  0x56   : > { %747 = vrot.lane.b32.xlu0 %v712_v28, %s2331_s6  ;;  %v741_v51 = vrot.slane %v740_v43, 4  ;;  %v745_v52 = vrot.slane %v743_v45, 5  ;;  %v1999_v55 = vrot.slane %v938_v48, 9  ;;  %408 = vst.msk [vmem:[#allocation2 + $0x4c] sm:$0xf] %vm383_vm6, %v403_v60 }
  0x57   : > { %v736_v54 = vsel %vm2439_vm5, %v731_v47, %v735_v35  ;;  %v958_v56 = vrot.slane %v956_v53, 4  ;;  %407 = vst.msk [vmem:[#allocation2 + $0x48] sm:$0xf] %vm383_vm6, %v402_v61 }
  0x58   : > { %749 = vrot.lane.b32.xlu1 %v722_v33, %s2331_s6  ;;  %v957_v58 = vsel %vm2401_vm2, %v1999_v55, %v956_v53 }
  0x5a   : > { %898 = vrot.lane.b32.xlu0 %v2605_v42, %s2330_s5  ;;  %v940_v42 = vld [vmem:[%s2533_s14 + $0x14] sm:$0x1] }
  0x5b   : > { %v959_v57 = vrot.slane %v940_v42, 5 }
  0x5c   : > { %900 = vrot.lane.b32.xlu1 %v2596_v44, %s2330_s5  ;;  %v746_v44 = vsel %vm2439_vm5, %v741_v51, %v745_v52 }
  0x5d   : > { %v960_v59 = vsel %vm2401_vm2, %v958_v56, %v959_v57 }
  0x5e   : > { %961 = vrot.lane.b32.xlu0 %v950_v46, %s2330_s5 }
  0x60   : > { %963 = vrot.lane.b32.xlu1 %v953_v49, %s2330_s5 }
  0x62   : > { %751 = vrot.lane.b32.xlu0 %v736_v54, %s2331_s6 }
  0x64   : > { %753 = vrot.lane.b32.xlu1 %v746_v44, %s2331_s6 }
  0x66   : > { %965 = vrot.lane.b32.xlu0 %v957_v58, %s2330_s5 }
  0x68   : > { %967 = vrot.lane.b32.xlu1 %v960_v59, %s2330_s5  ;;  %s1988_s5 = sshll.u32 %s2937_s16, 6 }
  0x69   : > { %s362_s6 = sadd.s32 %s1988_s5, %s1987_s30 }
  0x6a   : > { %s1989_s7 = sshll.u32 %s362_s6, 3 }
  0x6b   : > { %s2803_s12 = scalar_lea.vmem %s2920_s4, %s1989_s7 }
  0x8c   : > { %v871_v50 = vpop.permute.xlu0 %870 }
  0x8e   : > { %v873_v62 = vpop.permute.xlu1 %872 }
  0x90   : > { %v875_v63 = vpop.permute.xlu0 %874 }
  0x92   : > { %v877_v1 = vpop.permute.xlu1 %876 }
  0x94   : > { %v879_v2 = vpop.permute.xlu0 %878 }
  0x96   : > { %v881_v3 = vpop.permute.xlu1 %880 }
  0x98   : > { %v629_v0 = vpop.permute.xlu0 %628 }
  0x99   : > { %677 = vst.msk [vmem:[#allocation2] sm:$0xf] %vm676_vm8, %v629_v0 }
  0x9a   : > { %919 = vst.msk [vmem:[#allocation2] sm:$0xf] %vm918_vm9, %v871_v50  ;;  %v633_v4 = vpop.permute.xlu1 %632 }
  0x9b   : > { %679 = vst.msk [vmem:[#allocation2 + $0x8] sm:$0xf] %vm676_vm8, %v633_v4 }
  0x9c   : > { %921 = vst.msk [vmem:[#allocation2 + $0x8] sm:$0xf] %vm918_vm9, %v875_v63  ;;  %v631_v5 = vpop.permute.xlu0 %630 }
  0x9d   : > { %678 = vst.msk [vmem:[#allocation2 + $0x4] sm:$0xf] %vm676_vm8, %v631_v5 }
  0x9e   : > { %920 = vst.msk [vmem:[#allocation2 + $0x4] sm:$0xf] %vm918_vm9, %v873_v62  ;;  %v635_v6 = vpop.permute.xlu1 %634 }
  0x9f   : > { %680 = vst.msk [vmem:[#allocation2 + $0xc] sm:$0xf] %vm676_vm8, %v635_v6 }
  0xa0   : > { %922 = vst.msk [vmem:[#allocation2 + $0xc] sm:$0xf] %vm918_vm9, %v877_v1  ;;  %v637_v7 = vpop.permute.xlu0 %636 }
  0xa1   : > { %681 = vst.msk [vmem:[#allocation2 + $0x10] sm:$0xf] %vm676_vm8, %v637_v7 }
  0xa2   : > { %923 = vst.msk [vmem:[#allocation2 + $0x10] sm:$0xf] %vm918_vm9, %v879_v2  ;;  %v639_v8 = vpop.permute.xlu1 %638 }
  0xa3   : > { %682 = vst.msk [vmem:[#allocation2 + $0x14] sm:$0xf] %vm676_vm8, %v639_v8  ;;  %v2798_v8 = vld [vmem:[%s2919_s3] ss:$0 sm:$0xff] }
  0xa4   : > { %924 = vst.msk [vmem:[#allocation2 + $0x14] sm:$0xf] %vm918_vm9, %v881_v3  ;;  %v641_v9 = vpop.permute.xlu0 %640 }
  0xa5   : > { %683 = vst.msk [vmem:[#allocation2 + $0x18] sm:$0xf] %vm676_vm8, %v641_v9  ;;  %v2255_v10 = vld [vmem:[#allocation2] sm:$0xff]  }
  0xa6   : > { %v643_v11 = vpop.permute.xlu1 %642  ;;  %2153 = vmatprep.mubr.msk.bf16.mxu1 %vm1060_vm10, %v2255_v10 }
  0xa7   : > { %684 = vst.msk [vmem:[#allocation2 + $0x1c] sm:$0xf] %vm676_vm8, %v643_v11  ;;  %v2257_v12 = vld [vmem:[#allocation2 + $0x8] sm:$0xff]  }
  0xa8   : > { %v645_v13 = vpop.permute.xlu0 %644  ;;  %v2258_v14 = vld [vmem:[#allocation2 + $0x8] sm:$0xff]   ;;  %2135 = vmatprep.mubr.msk.bf16.mxu0 %vm1060_vm10, %v2257_v12 }
  0xa9   : > { %685 = vst.msk [vmem:[#allocation2 + $0x20] sm:$0xf] %vm676_vm8, %v645_v13  ;;  %2154 = vmatmul.mubr.msk.bf16.vlgmr.msra.gmra.mxu1 %vm1060_vm10, %v2258_v14  ;;  %v2273_v53 = vld [vmem:[#allocation2 + $0x8] sm:$0xff]  }
  0xaa   : > { %v647_v15 = vpop.permute.xlu1 %646  ;;  %2188 = vmatpush3.bf16.msra.mxu1 %v2673_v27 }
  0xab   : > { %686 = vst.msk [vmem:[#allocation2 + $0x24] sm:$0xf] %vm676_vm8, %v647_v15  ;;  %v2259_v16 = vld [vmem:[#allocation2 + $0x10] sm:$0xff]  }
  0xac   : > { %v883_v17 = vpop.permute.xlu0 %882  ;;  %v2260_v18 = vld [vmem:[#allocation2 + $0x10] sm:$0xff]   ;;  %2136 = vmatmul.mubr.msk.bf16.vlgmr.msra.gmra.mxu0 %vm1060_vm10, %v2259_v16 }
  0xad   : > { %925 = vst.msk [vmem:[#allocation2 + $0x18] sm:$0xf] %vm918_vm9, %v883_v17  ;;  %2157 = vmatprep.mubr.msk.bf16.mxu1 %vm1060_vm10, %v2260_v18  ;;  %2170 = vmatpush3.bf16.msra.mxu0 %v2663_v22  ;;  %v2275_v44 = vld [vmem:[#allocation2 + $0x10] sm:$0xff]  }
  0xae   : > { %v885_v19 = vpop.permute.xlu1 %884  ;;  %v2276_v56 = vld [vmem:[#allocation2 + $0x10] sm:$0xff]  }
  0xaf   : > { %926 = vst.msk [vmem:[#allocation2 + $0x1c] sm:$0xf] %vm918_vm9, %v885_v19 }
  0xb0   : > { %v887_v20 = vpop.permute.xlu0 %886 }
  0xb1   : > { %927 = vst.msk [vmem:[#allocation2 + $0x20] sm:$0xf] %vm918_vm9, %v887_v20 }
  0xb2   : > { %v889_v21 = vpop.permute.xlu1 %888 }
  0xb3   : > { %928 = vst.msk [vmem:[#allocation2 + $0x24] sm:$0xf] %vm918_vm9, %v889_v21 }
  0xb4   : > { %v649_v23 = vpop.permute.xlu0 %648 }
  0xb5   : > { %687 = vst.msk [vmem:[#allocation2 + $0x28] sm:$0xf] %vm676_vm8, %v649_v23 }
  0xb6   : > { %v651_v24 = vpop.permute.xlu1 %650  ;;  %v2261_v25 = vld [vmem:[#allocation2 + $0x18] sm:$0xff]  }
  0xb7   : > { %688 = vst.msk [vmem:[#allocation2 + $0x2c] sm:$0xf] %vm676_vm8, %v651_v24  ;;  %v2262_v27 = vld [vmem:[#allocation2 + $0x18] sm:$0xff]   ;;  %2139 = vmatprep.mubr.msk.bf16.mxu0 %vm1060_vm10, %v2261_v25 }
  0xb8   : > { %v653_v28 = vpop.permute.xlu0 %652  ;;  %2158 = vmatmul.mubr.msk.bf16.gmra.mxu1 %vm1060_vm10, %v2262_v27  ;;  %v2277_v57 = vld [vmem:[#allocation2 + $0x18] sm:$0xff]  }
  0xb9   : > { %689 = vst.msk [vmem:[#allocation2 + $0x30] sm:$0xf] %vm676_vm8, %v653_v28  ;;  %v2278_v58 = vld [vmem:[#allocation2 + $0x18] sm:$0xff]  }
  0xba   : > { %v655_v22 = vpop.permute.xlu1 %654  ;;  %v2263_v29 = vld [vmem:[#allocation2 + $0x20] sm:$0xff]  }
  0xbb   : > { %690 = vst.msk [vmem:[#allocation2 + $0x34] sm:$0xf] %vm676_vm8, %v655_v22  ;;  %v2264_v30 = vld [vmem:[#allocation2 + $0x20] sm:$0xff]   ;;  %2140 = vmatmul.mubr.msk.bf16.gmra.mxu0 %vm1060_vm10, %v2263_v29 }
  0xbc   : > { %v891_v32 = vpop.permute.xlu0 %890  ;;  %2161 = vmatprep.mubr.msk.bf16.mxu1 %vm1060_vm10, %v2264_v30  ;;  %v2279_v59 = vld [vmem:[#allocation2 + $0x20] sm:$0xff]  }
  0xbd   : > { %929 = vst.msk [vmem:[#allocation2 + $0x28] sm:$0xf] %vm918_vm9, %v891_v32  ;;  %v2280_v60 = vld [vmem:[#allocation2 + $0x20] sm:$0xff]  }
  0xbe   : > { %v893_v33 = vpop.permute.xlu1 %892 }
  0xbf   : > { %930 = vst.msk [vmem:[#allocation2 + $0x2c] sm:$0xf] %vm918_vm9, %v893_v33 }
  0xc0   : > { %v895_v34 = vpop.permute.xlu0 %894 }
  0xc1   : > { %931 = vst.msk [vmem:[#allocation2 + $0x30] sm:$0xf] %vm918_vm9, %v895_v34 }
  0xc2   : > { %v897_v35 = vpop.permute.xlu1 %896 }
  0xc3   : > { %932 = vst.msk [vmem:[#allocation2 + $0x34] sm:$0xf] %vm918_vm9, %v897_v35 }
  0xc4   : > { %v657_v36 = vpop.permute.xlu0 %656 }
  0xc5   : > { %691 = vst.msk [vmem:[#allocation2 + $0x38] sm:$0xf] %vm676_vm8, %v657_v36 }
  0xc6   : > { %v659_v37 = vpop.permute.xlu1 %658  ;;  %v2267_v38 = vld [vmem:[#allocation2 + $0x28] sm:$0xff]  }
  0xc7   : > { %692 = vst.msk [vmem:[#allocation2 + $0x3c] sm:$0xf] %vm676_vm8, %v659_v37  ;;  %v2268_v26 = vld [vmem:[#allocation2 + $0x28] sm:$0xff]   ;;  %2143 = vmatprep.mubr.msk.bf16.mxu0 %vm1060_vm10, %v2267_v38 }
  0xc8   : > { %v748_v39 = vpop.permute.xlu0 %747  ;;  %2162 = vmatmul.mubr.msk.bf16.gmra.mxu1 %vm1060_vm10, %v2268_v26  ;;  %v2281_v61 = vld [vmem:[#allocation2 + $0x28] sm:$0xff]  }
  0xc9   : > { %759 = vst.msk [vmem:[#allocation2 + $0x40] sm:$0xf] %vm676_vm8, %v748_v39  ;;  %v2282_v50 = vld [vmem:[#allocation2 + $0x28] sm:$0xff]  }
  0xca   : > { %v750_v40 = vpop.permute.xlu1 %749  ;;  %v2269_v41 = vld [vmem:[#allocation2 + $0x30] sm:$0xff]  }
  0xcb   : > { %760 = vst.msk [vmem:[#allocation2 + $0x44] sm:$0xf] %vm676_vm8, %v750_v40  ;;  %v2270_v43 = vld [vmem:[#allocation2 + $0x30] sm:$0xff]   ;;  %2144 = vmatmul.mubr.msk.bf16.gmra.mxu0 %vm1060_vm10, %v2269_v41 }
  0xcc   : > { %v899_v45 = vpop.permute.xlu0 %898  ;;  %2165 = vmatprep.mubr.msk.bf16.mxu1 %vm1060_vm10, %v2270_v43  ;;  %v2283_v62 = vld [vmem:[#allocation2 + $0x30] sm:$0xff]  }
  0xcd   : > { %933 = vst.msk [vmem:[#allocation2 + $0x38] sm:$0xf] %vm918_vm9, %v899_v45  ;;  %v2284_v63 = vld [vmem:[#allocation2 + $0x30] sm:$0xff]  }
  0xce   : > { %v901_v31 = vpop.permute.xlu1 %900 }
  0xcf   : > { %934 = vst.msk [vmem:[#allocation2 + $0x3c] sm:$0xf] %vm918_vm9, %v901_v31 }
  0xd0   : > { %v962_v46 = vpop.permute.xlu0 %961 }
  0xd1   : > { %973 = vst.msk [vmem:[#allocation2 + $0x40] sm:$0xf] %vm918_vm9, %v962_v46 }
  0xd2   : > { %v964_v47 = vpop.permute.xlu1 %963 }
  0xd3   : > { %974 = vst.msk [vmem:[#allocation2 + $0x44] sm:$0xf] %vm918_vm9, %v964_v47 }
  0xd4   : > { %v752_v48 = vpop.permute.xlu0 %751 }
  0xd5   : > { %761 = vst.msk [vmem:[#allocation2 + $0x48] sm:$0xf] %vm676_vm8, %v752_v48 }
  0xd6   : > { %v2271_v49 = vld [vmem:[#allocation2 + $0x38] sm:$0xff]   ;;  %v754_v51 = vpop.permute.xlu1 %753 }
  0xd7   : > { %v2272_v52 = vld [vmem:[#allocation2 + $0x38] sm:$0xff]   ;;  %762 = vst.msk [vmem:[#allocation2 + $0x4c] sm:$0xf] %vm676_vm8, %v754_v51  ;;  %2147 = vmatprep.mubr.msk.bf16.mxu0 %vm1060_vm10, %v2271_v49 }
  0xd8   : > { %v966_v42 = vpop.permute.xlu0 %965  ;;  %2166 = vmatmul.mubr.msk.bf16.gmra.mxu1 %vm1060_vm10, %v2272_v52  ;;  %v2285_v1 = vld [vmem:[#allocation2 + $0x38] sm:$0xff]  }
  0xd9   : > { %975 = vst.msk [vmem:[#allocation2 + $0x48] sm:$0xf] %vm918_vm9, %v966_v42  ;;  %2189 = vmatprep.mubr.msk.bf16.mxu1 %vm1060_vm10, %v2273_v53  ;;  %v2286_v2 = vld [vmem:[#allocation2 + $0x38] sm:$0xff]  }
  0xda   : > { %v2274_v54 = vld [vmem:[#allocation2 + $0x40] sm:$0xff]   ;;  %v968_v55 = vpop.permute.xlu1 %967 }
  0xdb   : > { %976 = vst.msk [vmem:[#allocation2 + $0x4c] sm:$0xf] %vm918_vm9, %v968_v55  ;;  %2148 = vmatmul.mubr.msk.bf16.gmra.mxu0 %vm1060_vm10, %v2274_v54  ;;  %v2287_v3 = vld [vmem:[#allocation2 + $0x40] sm:$0xff]  }
  0xdc   : > { %2171 = vmatprep.mubr.msk.bf16.mxu0 %vm1060_vm10, %v2275_v44  ;;  %v2288_v0 = vld [vmem:[#allocation2 + $0x40] sm:$0xff]  }
  0xe0   : > { %2190 = vmatmul.mubr.msk.bf16.vlgmr.msra.gmra.mxu1 %vm1060_vm10, %v2276_v56 }
  0xe1   : > { %2193 = vmatprep.mubr.msk.bf16.mxu1 %vm1060_vm10, %v2277_v57 }
  0xe2   : > { %v2289_v4 = vld [vmem:[#allocation2 + $0x48] sm:$0xff]  }
  0xe3   : > { %2172 = vmatmul.mubr.msk.bf16.vlgmr.msra.gmra.mxu0 %vm1060_vm10, %v2278_v58 }
  0xe4   : > { %2175 = vmatprep.mubr.msk.bf16.mxu0 %vm1060_vm10, %v2279_v59 }
  0xe8   : > { %2194 = vmatmul.mubr.msk.bf16.gmra.mxu1 %vm1060_vm10, %v2280_v60 }
  0xe9   : > { %2197 = vmatprep.mubr.msk.bf16.mxu1 %vm1060_vm10, %v2281_v61 }
  0xeb   : > { %2176 = vmatmul.mubr.msk.bf16.gmra.mxu0 %vm1060_vm10, %v2282_v50 }
  0xec   : > { %2179 = vmatprep.mubr.msk.bf16.mxu0 %vm1060_vm10, %v2283_v62 }
  0xf0   : > { %2198 = vmatmul.mubr.msk.bf16.gmra.mxu1 %vm1060_vm10, %v2284_v63 }
  0xf1   : > { %2201 = vmatprep.mubr.msk.bf16.mxu1 %vm1060_vm10, %v2285_v1 }
  0xf3   : > { %2180 = vmatmul.mubr.msk.bf16.gmra.mxu0 %vm1060_vm10, %v2286_v2 }
  0xf4   : > { %2183 = vmatprep.mubr.msk.bf16.mxu0 %vm1060_vm10, %v2287_v3 }
  0xf8   : > { %2202 = vmatmul.mubr.msk.bf16.gmra.mxu1 %vm1060_vm10, %v2288_v0 }
  0xfb   : > { %2184 = vmatmul.mubr.msk.bf16.gmra.mxu0 %vm1060_vm10, %v2289_v4 }
 0x169   : > { %v2155_v5 = vpop.f32.mrf.mxu1 }
 0x16b   : > { %v1292_v6 = vpop.f32.mrf.mxu1 }
 0x16c   : > { %v2137_v7 = vpop.f32.mrf.mxu0 }
 0x16d   : > { %v1301_v9 = vadd.f32 %v2155_v5, %v2137_v7  ;;  %v2156_v10 = vpop.f32.mrf.mxu1 }
 0x16e   : > { %v1123_v11 = vpop.f32.mrf.mxu0 }
 0x16f   : > { %v1364_v12 = vadd.f32 %v2798_v8, %v1301_v9  ;;  %v1293_v13 = vadd.f32 %v1292_v6, %v1123_v11  ;;  %v1295_v17 = vpop.f32.mrf.mxu1 }
 0x170   : > { %v2138_v14 = vpop.f32.mrf.mxu0 }
 0x171   : > { %1381 = vst.msk [vmem:[%s2803_s12 + $0x20] sm:$0xff] %vm1378_vm11, %v1364_v12  ;;  %v1362_v15 = vadd.f32 %v2798_v8, %v1293_v13  ;;  %v1304_v16 = vadd.f32 %v2156_v10, %v2138_v14 }
 0x172   : > { %v1126_v18 = vpop.f32.mrf.mxu0 }
 0x173   : > { %1379 = vst.msk [vmem:[%s2803_s12] sm:$0xff] %vm1378_vm11, %v1362_v15  ;;  %v1365_v19 = vadd.f32 %v2798_v8, %v1304_v16  ;;  %v1296_v20 = vadd.f32 %v1295_v17, %v1126_v18 }
 0x175   : > { %1382 = vst.msk [vmem:[%s2803_s12 + $0x28] sm:$0xff] %vm1378_vm11, %v1365_v19  ;;  %v1363_v21 = vadd.f32 %v2798_v8, %v1296_v20 }
 0x177   : > { %1380 = vst.msk [vmem:[%s2803_s12 + $0x8] sm:$0xff] %vm1378_vm11, %v1363_v21 }
 0x178   : > { %v2159_v23 = vpop.f32.mrf.mxu1 }
 0x17a   : > { %v1308_v24 = vpop.f32.mrf.mxu1 }
 0x17b   : > { %v2141_v25 = vpop.f32.mrf.mxu0 }
 0x17c   : > { %v1317_v27 = vadd.f32 %v2159_v23, %v2141_v25  ;;  %v2160_v28 = vpop.f32.mrf.mxu1 }
 0x17d   : > { %v1139_v22 = vpop.f32.mrf.mxu0 }
 0x17e   : > { %v1368_v29 = vadd.f32 %v2798_v8, %v1317_v27  ;;  %v1309_v30 = vadd.f32 %v1308_v24, %v1139_v22  ;;  %v1311_v35 = vpop.f32.mrf.mxu1 }
 0x17f   : > { %v2142_v32 = vpop.f32.mrf.mxu0 }
 0x180   : > { %1385 = vst.msk [vmem:[%s2803_s12 + $0x60] sm:$0xff] %vm1378_vm11, %v1368_v29  ;;  %v1366_v33 = vadd.f32 %v2798_v8, %v1309_v30  ;;  %v1320_v34 = vadd.f32 %v2160_v28, %v2142_v32 }
 0x181   : > { %v1142_v36 = vpop.f32.mrf.mxu0 }
 0x182   : > { %1383 = vst.msk [vmem:[%s2803_s12 + $0x40] sm:$0xff] %vm1378_vm11, %v1366_v33  ;;  %v1369_v37 = vadd.f32 %v2798_v8, %v1320_v34  ;;  %v1312_v38 = vadd.f32 %v1311_v35, %v1142_v36 }
 0x184   : > { %1386 = vst.msk [vmem:[%s2803_s12 + $0x68] sm:$0xff] %vm1378_vm11, %v1369_v37  ;;  %v1367_v26 = vadd.f32 %v2798_v8, %v1312_v38 }
 0x186   : > { %1384 = vst.msk [vmem:[%s2803_s12 + $0x48] sm:$0xff] %vm1378_vm11, %v1367_v26 }
 0x188   : > { %v2163_v39 = vpop.f32.mrf.mxu1 }
 0x18a   : > { %v1324_v40 = vpop.f32.mrf.mxu1 }
 0x18b   : > { %v2145_v41 = vpop.f32.mrf.mxu0 }
 0x18c   : > { %v1333_v43 = vadd.f32 %v2163_v39, %v2145_v41  ;;  %v2164_v45 = vpop.f32.mrf.mxu1 }
 0x18d   : > { %v1155_v31 = vpop.f32.mrf.mxu0 }
 0x18e   : > { %v1372_v46 = vadd.f32 %v2798_v8, %v1333_v43  ;;  %v1325_v47 = vadd.f32 %v1324_v40, %v1155_v31  ;;  %v1327_v52 = vpop.f32.mrf.mxu1 }
 0x18f   : > { %v2146_v48 = vpop.f32.mrf.mxu0 }
 0x190   : > { %1389 = vst.msk [vmem:[%s2803_s12 + $0xa0] sm:$0xff] %vm1378_vm11, %v1372_v46  ;;  %v1370_v49 = vadd.f32 %v2798_v8, %v1325_v47  ;;  %v1336_v51 = vadd.f32 %v2164_v45, %v2146_v48 }
 0x191   : > { %v1158_v53 = vpop.f32.mrf.mxu0 }
 0x192   : > { %1387 = vst.msk [vmem:[%s2803_s12 + $0x80] sm:$0xff] %vm1378_vm11, %v1370_v49  ;;  %v1373_v42 = vadd.f32 %v2798_v8, %v1336_v51  ;;  %v1328_v54 = vadd.f32 %v1327_v52, %v1158_v53 }
 0x194   : > { %1390 = vst.msk [vmem:[%s2803_s12 + $0xa8] sm:$0xff] %vm1378_vm11, %v1373_v42  ;;  %v1371_v55 = vadd.f32 %v2798_v8, %v1328_v54 }
 0x196   : > { %1388 = vst.msk [vmem:[%s2803_s12 + $0x88] sm:$0xff] %vm1378_vm11, %v1371_v55 }
 0x198   : > { %v2167_v44 = vpop.f32.mrf.mxu1 }
 0x19a   : > { %v1340_v56 = vpop.f32.mrf.mxu1 }
 0x19b   : > { %v2149_v57 = vpop.f32.mrf.mxu0 }
 0x19c   : > { %v1349_v58 = vadd.f32 %v2167_v44, %v2149_v57  ;;  %v2168_v59 = vpop.f32.mrf.mxu1 }
 0x19d   : > { %v1171_v60 = vpop.f32.mrf.mxu0 }
 0x19e   : > { %v1376_v61 = vadd.f32 %v2798_v8, %v1349_v58  ;;  %v1341_v50 = vadd.f32 %v1340_v56, %v1171_v60  ;;  %v1343_v62 = vpop.f32.mrf.mxu1 }
 0x19f   : > { %v2150_v63 = vpop.f32.mrf.mxu0 }
 0x1a0   : > { %1393 = vst.msk [vmem:[%s2803_s12 + $0xe0] sm:$0xff] %vm1378_vm11, %v1376_v61  ;;  %v1374_v1 = vadd.f32 %v2798_v8, %v1341_v50  ;;  %v1352_v2 = vadd.f32 %v2168_v59, %v2150_v63  ;;  %v2191_v3 = vpop.f32.mrf.mxu1 }
 0x1a1   : > { %v1174_v0 = vpop.f32.mrf.mxu0 }
 0x1a2   : > { %1391 = vst.msk [vmem:[%s2803_s12 + $0xc0] sm:$0xff] %vm1378_vm11, %v1374_v1  ;;  %v1377_v4 = vadd.f32 %v2798_v8, %v1352_v2  ;;  %v1344_v5 = vadd.f32 %v1343_v62, %v1174_v0  ;;  %v1709_v6 = vpop.f32.mrf.mxu1 }
 0x1a3   : > { %v2173_v7 = vpop.f32.mrf.mxu0 }
 0x1a4   : > { %1394 = vst.msk [vmem:[%s2803_s12 + $0xe8] sm:$0xff] %vm1378_vm11, %v1377_v4  ;;  %v1375_v9 = vadd.f32 %v2798_v8, %v1344_v5  ;;  %v1718_v10 = vadd.f32 %v2191_v3, %v2173_v7  ;;  %v2192_v11 = vpop.f32.mrf.mxu1 }
 0x1a5   : > { %v1540_v12 = vpop.f32.mrf.mxu0 }
 0x1a6   : > { %1392 = vst.msk [vmem:[%s2803_s12 + $0xc8] sm:$0xff] %vm1378_vm11, %v1375_v9  ;;  %v1781_v13 = vadd.f32 %v2798_v8, %v1718_v10  ;;  %v1710_v14 = vadd.f32 %v1709_v6, %v1540_v12  ;;  %v1712_v15 = vpop.f32.mrf.mxu1 }
 0x1a7   : > { %v2174_v16 = vpop.f32.mrf.mxu0 }
 0x1a8   : > { %2078 = vst.msk [vmem:[%s2803_s12 + $0x30] sm:$0xff] %vm1378_vm11, %v1781_v13  ;;  %v1779_v17 = vadd.f32 %v2798_v8, %v1710_v14  ;;  %v1721_v18 = vadd.f32 %v2192_v11, %v2174_v16  ;;  %v2195_v19 = vpop.f32.mrf.mxu1 }
 0x1a9   : > { %v1543_v20 = vpop.f32.mrf.mxu0 }
 0x1aa   : > { %2076 = vst.msk [vmem:[%s2803_s12 + $0x10] sm:$0xff] %vm1378_vm11, %v1779_v17  ;;  %v1782_v21 = vadd.f32 %v2798_v8, %v1721_v18  ;;  %v1713_v23 = vadd.f32 %v1712_v15, %v1543_v20  ;;  %v1725_v24 = vpop.f32.mrf.mxu1 }
 0x1ab   : > { %v2177_v25 = vpop.f32.mrf.mxu0 }
 0x1ac   : > { %2079 = vst.msk [vmem:[%s2803_s12 + $0x38] sm:$0xff] %vm1378_vm11, %v1782_v21  ;;  %v1780_v27 = vadd.f32 %v2798_v8, %v1713_v23  ;;  %v1734_v28 = vadd.f32 %v2195_v19, %v2177_v25  ;;  %v2196_v22 = vpop.f32.mrf.mxu1 }
 0x1ad   : > { %v1556_v29 = vpop.f32.mrf.mxu0 }
 0x1ae   : > { %2077 = vst.msk [vmem:[%s2803_s12 + $0x18] sm:$0xff] %vm1378_vm11, %v1780_v27  ;;  %v1785_v30 = vadd.f32 %v2798_v8, %v1734_v28  ;;  %v1726_v32 = vadd.f32 %v1725_v24, %v1556_v29  ;;  %v1728_v33 = vpop.f32.mrf.mxu1 }
 0x1af   : > { %v2178_v34 = vpop.f32.mrf.mxu0 }
 0x1b0   : > { %2082 = vst.msk [vmem:[%s2803_s12 + $0x70] sm:$0xff] %vm1378_vm11, %v1785_v30  ;;  %v1783_v35 = vadd.f32 %v2798_v8, %v1726_v32  ;;  %v1737_v36 = vadd.f32 %v2196_v22, %v2178_v34  ;;  %v2199_v37 = vpop.f32.mrf.mxu1 }
 0x1b1   : > { %v1559_v38 = vpop.f32.mrf.mxu0 }
 0x1b2   : > { %2080 = vst.msk [vmem:[%s2803_s12 + $0x50] sm:$0xff] %vm1378_vm11, %v1783_v35  ;;  %v1786_v26 = vadd.f32 %v2798_v8, %v1737_v36  ;;  %v1729_v39 = vadd.f32 %v1728_v33, %v1559_v38  ;;  %v1741_v40 = vpop.f32.mrf.mxu1 }
 0x1b3   : > { %v2181_v41 = vpop.f32.mrf.mxu0 }
 0x1b4   : > { %2083 = vst.msk [vmem:[%s2803_s12 + $0x78] sm:$0xff] %vm1378_vm11, %v1786_v26  ;;  %v1784_v43 = vadd.f32 %v2798_v8, %v1729_v39  ;;  %v1750_v45 = vadd.f32 %v2199_v37, %v2181_v41  ;;  %v2200_v31 = vpop.f32.mrf.mxu1 }
 0x1b5   : > { %v1572_v46 = vpop.f32.mrf.mxu0 }
 0x1b6   : > { %2081 = vst.msk [vmem:[%s2803_s12 + $0x58] sm:$0xff] %vm1378_vm11, %v1784_v43  ;;  %v1789_v47 = vadd.f32 %v2798_v8, %v1750_v45  ;;  %v1742_v48 = vadd.f32 %v1741_v40, %v1572_v46  ;;  %v1744_v49 = vpop.f32.mrf.mxu1 }
 0x1b7   : > { %v2182_v51 = vpop.f32.mrf.mxu0 }
 0x1b8   : > { %2086 = vst.msk [vmem:[%s2803_s12 + $0xb0] sm:$0xff] %vm1378_vm11, %v1789_v47  ;;  %v1787_v52 = vadd.f32 %v2798_v8, %v1742_v48  ;;  %v1753_v53 = vadd.f32 %v2200_v31, %v2182_v51  ;;  %v2203_v42 = vpop.f32.mrf.mxu1 }
 0x1b9   : > { %v1575_v54 = vpop.f32.mrf.mxu0 }
 0x1ba   : > { %2084 = vst.msk [vmem:[%s2803_s12 + $0x90] sm:$0xff] %vm1378_vm11, %v1787_v52  ;;  %v1790_v55 = vadd.f32 %v2798_v8, %v1753_v53  ;;  %v1745_v44 = vadd.f32 %v1744_v49, %v1575_v54  ;;  %v1757_v56 = vpop.f32.mrf.mxu1 }
 0x1bb   : > { %v2185_v57 = vpop.f32.mrf.mxu0 }
 0x1bc   : > { %2087 = vst.msk [vmem:[%s2803_s12 + $0xb8] sm:$0xff] %vm1378_vm11, %v1790_v55  ;;  %v1788_v58 = vadd.f32 %v2798_v8, %v1745_v44  ;;  %v1766_v59 = vadd.f32 %v2203_v42, %v2185_v57  ;;  %v2204_v60 = vpop.f32.mrf.mxu1 }
 0x1bd   : > { %v1588_v61 = vpop.f32.mrf.mxu0 }
 0x1be   : > { %2085 = vst.msk [vmem:[%s2803_s12 + $0x98] sm:$0xff] %vm1378_vm11, %v1788_v58  ;;  %v1793_v50 = vadd.f32 %v2798_v8, %v1766_v59  ;;  %v1758_v62 = vadd.f32 %v1757_v56, %v1588_v61  ;;  %v1760_v3 = vpop.f32.mrf.mxu1 }
 0x1bf   : > { %v2186_v63 = vpop.f32.mrf.mxu0 }
 0x1c0   : > { %2090 = vst.msk [vmem:[%s2803_s12 + $0xf0] sm:$0xff] %vm1378_vm11, %v1793_v50  ;;  %v1791_v1 = vadd.f32 %v2798_v8, %v1758_v62  ;;  %v1769_v2 = vadd.f32 %v2204_v60, %v2186_v63 }
 0x1c1   : > { %v1591_v0 = vpop.f32.mrf.mxu0 }
 0x1c2   : > { %2088 = vst.msk [vmem:[%s2803_s12 + $0xd0] sm:$0xff] %vm1378_vm11, %v1791_v1  ;;  %v1794_v4 = vadd.f32 %v2798_v8, %v1769_v2  ;;  %v1761_v5 = vadd.f32 %v1760_v3, %v1591_v0 }
 0x1c4   : > { %2091 = vst.msk [vmem:[%s2803_s12 + $0xf8] sm:$0xff] %vm1378_vm11, %v1794_v4  ;;  %v1792_v6 = vadd.f32 %v2798_v8, %v1761_v5 }
 0x1c6   : > { %2089 = vst.msk [vmem:[%s2803_s12 + $0xd8] sm:$0xff] %vm1378_vm11, %v1792_v6 }
 0x1c7 PF: > { %s14_s19 = sadd.s32 1, %s2328_s19   ;;  %s2926_s15 = smov %s2320_s17 }
 0x1c8   : > { %p11_p9 = scmp.ge.s32.totalorder %s14_s19, 6   ;;  %s2927_s16 = smov %s2324_s18 }
 0x1c9   : > { %s2928_s17 = smov %s2931_s20  ;;  %s2929_s18 = smov %s2935_s21 }
 0x1ca   :  { %13 = sbr.rel (!%p11_p9) target bundleno = 3 (0x3), region = 82 }

</bundles_post_ra>
